<compile_context>
chip_gen: v7x
topology: tpu7x:2x2x1
jax: 0.10.0
libtpu: 0.0.40
codegen_flags: <defaults>
</compile_context>

<pallas_src>
import functools
import math

import jax
import jax.numpy as jnp
from jax.experimental import pallas as pl
from jax.experimental.pallas import tpu as pltpu

_TM_MAX = 512            # max rows (M) per grid step; safe for v7x 64 MiB VMEM
_TCO_MAX = 512           # max Cout tile
_TK_CANDIDATES = (512, 384, 256, 128)
_BN_EPS = 1e-5
_LEAKY = 0.1
_VMEM_LIMIT = 48 * 1024 * 1024


def _round_up(x, m):
    return (x + m - 1) // m * m


def _cdiv(a, b):
    return (a + b - 1) // b


def _pick_k_tiling(kd):
    """Return (tk, Kd_padded).  tk is always a multiple of 128."""
    kd_p = _round_up(kd, 128)
    if kd_p <= 1024:                       # single K step, no re-accumulation
        return kd_p, kd_p
    for cand in _TK_CANDIDATES:
        if kd_p % cand == 0:
            return cand, kd_p
    # No even divisor: pad K up to a multiple of 512 (zero columns are exact)
    # instead of taking many tiny 128-wide K steps.
    return 512, _round_up(kd_p, 512)


# ----------------------------- Pallas kernels -------------------------------

def _make_fused_kernel(m_true, with_residual):
    """Matmul + exact batch-BN + LeakyReLU (+ residual) in one kernel.

    Requires the whole M dimension resident (num_m == 1).  Grid is
    (num_co, num_k) with the K axis innermost ("arbitrary")."""
    inv_m = 1.0 / float(m_true)

    def _epilogue(acc, g, b, r, o_ref):
        mean = jnp.sum(acc, axis=0, keepdims=True) * inv_m
        var = jnp.maximum(
            jnp.sum(acc * acc, axis=0, keepdims=True) * inv_m - mean * mean, 0.0)
        rstd = jax.lax.rsqrt(var + _BN_EPS)
        scale = g * rstd
        shift = b - mean * scale
        z = acc * scale + shift
        z = jnp.where(z >= 0, z, _LEAKY * z)
        if r is not None:
            z = z + r.astype(jnp.float32)
        o_ref[...] = z.astype(o_ref.dtype)

    if with_residual:
        def kernel(x_ref, w_ref, g_ref, b_ref, r_ref, o_ref, acc_ref):
            k = pl.program_id(1)

            @pl.when(k == 0)
            def _():
                acc_ref[...] = jnp.zeros_like(acc_ref)

            acc_ref[...] += jnp.dot(x_ref[...], w_ref[...],
                                    preferred_element_type=jnp.float32)

            @pl.when(k == pl.num_programs(1) - 1)
            def _():
                _epilogue(acc_ref[...], g_ref[...], b_ref[...], r_ref[...],
                          o_ref)
    else:
        def kernel(x_ref, w_ref, g_ref, b_ref, o_ref, acc_ref):
            k = pl.program_id(1)

            @pl.when(k == 0)
            def _():
                acc_ref[...] = jnp.zeros_like(acc_ref)

            acc_ref[...] += jnp.dot(x_ref[...], w_ref[...],
                                    preferred_element_type=jnp.float32)

            @pl.when(k == pl.num_programs(1) - 1)
            def _():
                _epilogue(acc_ref[...], g_ref[...], b_ref[...], None, o_ref)

    return kernel


def _matmul_stats_kernel(x_ref, w_ref, y_ref, stats_ref, acc_ref):
    """Pass 1 of the num_m > 1 path: bf16 matmul, f32 accumulation in a VMEM
    scratch, bf16 spill of the raw conv output plus per-(M tile, channel)
    partial sum / sum-of-squares for the BN batch statistics."""
    k = pl.program_id(1)

    @pl.when(k == 0)
    def _():
        acc_ref[...] = jnp.zeros_like(acc_ref)

    acc_ref[...] += jnp.dot(x_ref[...], w_ref[...],
                            preferred_element_type=jnp.float32)

    @pl.when(k == pl.num_programs(1) - 1)
    def _():
        acc = acc_ref[...]
        y_ref[...] = acc.astype(y_ref.dtype)
        s = jnp.sum(acc, axis=0, keepdims=True)
        ss = jnp.sum(acc * acc, axis=0, keepdims=True)
        stats_ref[...] = jnp.concatenate([s, ss], axis=0)[None]


def _bn_leaky_kernel(y_ref, scale_ref, shift_ref, o_ref):
    z = y_ref[...].astype(jnp.float32) * scale_ref[...] + shift_ref[...]
    o_ref[...] = jnp.where(z >= 0, z, _LEAKY * z).astype(o_ref.dtype)


def _bn_leaky_res_kernel(y_ref, scale_ref, shift_ref, r_ref, o_ref):
    z = y_ref[...].astype(jnp.float32) * scale_ref[...] + shift_ref[...]
    z = jnp.where(z >= 0, z, _LEAKY * z) + r_ref[...].astype(jnp.float32)
    o_ref[...] = z.astype(o_ref.dtype)


# ------------------------ ConvBlock = conv + BN + leaky ----------------------

def _conv_bn_leaky(patches, wmat, gamma, beta, residual):
    """patches: (M, Kd), wmat: (Kd, Cout) -> (M, Cout) bfloat16.

    BatchNorm uses exact full-batch statistics (biased variance), matching a
    PyTorch BatchNorm2d in training mode.  `residual` (optional, (M, Cout))
    is added after the LeakyReLU."""
    M, Kd = patches.shape
    Cout = wmat.shape[1]
    Co_p = _round_up(Cout, 128)
    tk, Kd_p = _pick_k_tiling(Kd)
    num_k = Kd_p // tk

    # Balanced M tiling.
    num_m = _cdiv(M, _TM_MAX)
    tm = _round_up(_cdiv(M, num_m), 16)
    M_p = tm * num_m

    # Padded bf16 operands for the MXU (accumulation stays f32).
    x = patches.astype(jnp.bfloat16)
    x = jnp.pad(x, ((0, M_p - M), (0, Kd_p - Kd)))
    w = wmat.astype(jnp.bfloat16)
    w = jnp.pad(w, ((0, Kd_p - Kd), (0, Co_p - Cout)))
    g = jnp.pad(gamma, (0, Co_p - Cout)).reshape(1, Co_p)
    b = jnp.pad(beta, (0, Co_p - Cout)).reshape(1, Co_p)
    r = None
    if residual is not None:
        r = jnp.pad(residual.astype(jnp.bfloat16),
                    ((0, M_p - M), (0, Co_p - Cout)))

    cost = pl.CostEstimate(
        flops=2 * M_p * Kd_p * Co_p,
        transcendentals=0,
        bytes_accessed=(M_p * Kd_p * 2 + num_m * Kd_p * Co_p * 2
                        + M_p * Co_p * 2))

    if num_m == 1:
        # ---- fully fused single pallas_call ---------------------------------
        # Split Cout so a v7x megacore gets >= 2 "parallel" grid steps on the
        # tiny-M deep layers (the re-read of the small patches block is free).
        tco = Co_p
        if M_p <= 128 and Co_p >= 256 and (Co_p // 2) % 128 == 0:
            tco = Co_p // 2
        elif Co_p > _TCO_MAX and Co_p % _TCO_MAX == 0:
            tco = _TCO_MAX
        num_co = Co_p // tco

        kernel = _make_fused_kernel(M, residual is not None)
        in_specs = [
            pl.BlockSpec((tm, tk), lambda c, k: (0, k)),
            pl.BlockSpec((tk, tco), lambda c, k: (k, c)),
            pl.BlockSpec((1, tco), lambda c, k: (0, c)),
            pl.BlockSpec((1, tco), lambda c, k: (0, c)),
        ]
        inputs = [x, w, g, b]
        if r is not None:
            in_specs.append(pl.BlockSpec((tm, tco), lambda c, k: (0, c)))
            inputs.append(r)

        out = pl.pallas_call(
            kernel,
            out_shape=jax.ShapeDtypeStruct((M_p, Co_p), jnp.bfloat16),
            grid_spec=pltpu.PrefetchScalarGridSpec(
                num_scalar_prefetch=0,
                grid=(num_co, num_k),
                in_specs=in_specs,
                out_specs=pl.BlockSpec((tm, tco), lambda c, k: (0, c)),
                scratch_shapes=[pltpu.VMEM((tm, tco), jnp.float32)]),
            compiler_params=pltpu.CompilerParams(
                dimension_semantics=("parallel", "arbitrary"),
                vmem_limit_bytes=_VMEM_LIMIT),
            cost_estimate=cost,
        )(*inputs)
        return out[:M, :Cout]

    # ---- num_m > 1: two-pass path (large batch / resolution) ----------------
    y_raw, pstats = pl.pallas_call(
        _matmul_stats_kernel,
        out_shape=(jax.ShapeDtypeStruct((M_p, Co_p), jnp.bfloat16),
                   jax.ShapeDtypeStruct((num_m, 2, Co_p), jnp.float32)),
        grid_spec=pltpu.PrefetchScalarGridSpec(
            num_scalar_prefetch=0,
            grid=(num_m, num_k),
            in_specs=[
                pl.BlockSpec((tm, tk), lambda m, k: (m, k)),
                pl.BlockSpec((tk, Co_p), lambda m, k: (k, 0)),
            ],
            out_specs=[
                pl.BlockSpec((tm, Co_p), lambda m, k: (m, 0)),
                pl.BlockSpec((1, 2, Co_p), lambda m, k: (m, 0, 0)),
            ],
            scratch_shapes=[pltpu.VMEM((tm, Co_p), jnp.float32)]),
        compiler_params=pltpu.CompilerParams(
            dimension_semantics=("parallel", "arbitrary"),
            vmem_limit_bytes=_VMEM_LIMIT),
        cost_estimate=cost,
    )(x, w)

    # Tiny XLA glue: exact full-batch BN statistics (biased variance); padded
    # rows contribute zero to both sums, so dividing by the true M is exact.
    sums = jnp.sum(pstats, axis=0)
    mean = sums[0] / M
    var = jnp.maximum(sums[1] / M - mean * mean, 0.0)
    rstd = jax.lax.rsqrt(var + _BN_EPS)
    gamma_p = jnp.pad(gamma, (0, Co_p - Cout))
    beta_p = jnp.pad(beta, (0, Co_p - Cout))
    scale = (gamma_p * rstd).reshape(1, Co_p)
    shift = (beta_p - mean * gamma_p * rstd).reshape(1, Co_p)

    if r is None:
        kernel2 = _bn_leaky_kernel
        in_specs2 = [
            pl.BlockSpec((tm, Co_p), lambda m: (m, 0)),
            pl.BlockSpec((1, Co_p), lambda m: (0, 0)),
            pl.BlockSpec((1, Co_p), lambda m: (0, 0)),
        ]
        inputs2 = [y_raw, scale, shift]
    else:
        kernel2 = _bn_leaky_res_kernel
        in_specs2 = [
            pl.BlockSpec((tm, Co_p), lambda m: (m, 0)),
            pl.BlockSpec((1, Co_p), lambda m: (0, 0)),
            pl.BlockSpec((1, Co_p), lambda m: (0, 0)),
            pl.BlockSpec((tm, Co_p), lambda m: (m, 0)),
        ]
        inputs2 = [y_raw, scale, shift, r]

    out = pl.pallas_call(
        kernel2,
        out_shape=jax.ShapeDtypeStruct((M_p, Co_p), jnp.bfloat16),
        grid_spec=pltpu.PrefetchScalarGridSpec(
            num_scalar_prefetch=0,
            grid=(num_m,),
            in_specs=in_specs2,
            out_specs=pl.BlockSpec((tm, Co_p), lambda m: (m, 0))),
        compiler_params=pltpu.CompilerParams(
            dimension_semantics=("parallel",),
            vmem_limit_bytes=_VMEM_LIMIT),
    )(*inputs2)
    return out[:M, :Cout]


# jit so repeated ResBlocks with identical shapes reuse one compiled kernel.
conv_bn_leaky = jax.jit(_conv_bn_leaky)


# ------------------------------- JAX glue -----------------------------------

def extract_patches(x, ksize, stride, padding):
    """x: (N, H, W, C) -> ((N*Ho*Wo, ksize*ksize*C), Ho, Wo).

    Patch feature order is (kh, kw, cin) major->minor, matching the weight
    reshape (kh, kw, cin, cout) -> (kh*kw*cin, cout)."""
    N, H, W, C = x.shape
    Ho = (H + 2 * padding - ksize) // stride + 1
    Wo = (W + 2 * padding - ksize) // stride + 1
    if ksize == 1 and stride == 1 and padding == 0:
        return x.reshape(N * H * W, C), Ho, Wo
    if padding:
        x = jnp.pad(x, ((0, 0), (padding, padding), (padding, padding), (0, 0)))
    cols = []
    for dh in range(ksize):
        for dw in range(ksize):
            cols.append(
                x[:, dh:dh + stride * Ho:stride, dw:dw + stride * Wo:stride, :])
    patches = jnp.concatenate(cols, axis=-1)
    return patches.reshape(N * Ho * Wo, ksize * ksize * C), Ho, Wo


def conv_block(x, p, stride, padding, residual=None):
    N = x.shape[0]
    ksize = p["ksize"]
    cin = x.shape[-1]
    cout = p["w"].shape[-1]
    patches, Ho, Wo = extract_patches(x, ksize, stride, padding)
    wmat = p["w"].reshape(ksize * ksize * cin, cout)
    y = conv_bn_leaky(patches, wmat, p["gamma"], p["beta"], residual)
    return y.reshape(N, Ho, Wo, cout)


def res_block(x, p):
    N, H, W, C = x.shape
    out = conv_block(x, p["l1"], stride=1, padding=0)            # 1x1, C -> C/2
    # 3x3, C/2 -> C; the residual add is fused into the kernel epilogue.
    out = conv_block(out, p["l2"], stride=1, padding=1,
                     residual=x.reshape(N * H * W, C))
    return out


# ------------------------------ parameters -----------------------------------

def init_conv_block(key, cin, cout, ksize):
    # kaiming_normal_, mode='fan_out', nonlinearity='leaky_relu' (a=0 -> sqrt(2))
    fan_out = cout * ksize * ksize
    std = math.sqrt(2.0 / fan_out)
    w = jax.random.normal(key, (ksize, ksize, cin, cout), jnp.float32) * std
    return {"w": w,
            "gamma": jnp.ones((cout,), jnp.float32),
            "beta": jnp.zeros((cout,), jnp.float32),
            "ksize": ksize}


def init_darknet53(key, num_classes=10):
    keys = iter(jax.random.split(key, 128))

    def cb(cin, cout, k):
        return init_conv_block(next(keys), cin, cout, k)

    def res_stage(ch, n):
        return [{"l1": cb(ch, ch // 2, 1), "l2": cb(ch // 2, ch, 3)}
                for _ in range(n)]

    params = {}
    params["conv1"] = cb(3, 32, 3)
    params["conv2"] = cb(32, 64, 3)
    params["res1"] = res_stage(64, 1)
    params["conv3"] = cb(64, 128, 3)
    params["res2"] = res_stage(128, 2)
    params["conv4"] = cb(128, 256, 3)
    params["res3"] = res_stage(256, 8)
    params["conv5"] = cb(256, 512, 3)
    params["res4"] = res_stage(512, 8)
    params["conv6"] = cb(512, 1024, 3)
    params["res5"] = res_stage(1024, 4)
    # nn.Linear: weight ~ N(0, 0.01), bias = 0
    params["fc_w"] = jax.random.normal(next(keys), (1024, num_classes),
                                       jnp.float32) * 0.01
    params["fc_b"] = jnp.zeros((num_classes,), jnp.float32)
    return params


# ------------------------------- forward ------------------------------------

def darknet53_forward(x_nchw, params):
    x = jnp.transpose(x_nchw, (0, 2, 3, 1)).astype(jnp.bfloat16)  # NCHW -> NHWC
    x = conv_block(x, params["conv1"], stride=1, padding=1)
    x = conv_block(x, params["conv2"], stride=2, padding=1)
    for rp in params["res1"]:
        x = res_block(x, rp)
    x = conv_block(x, params["conv3"], stride=2, padding=1)
    for rp in params["res2"]:
        x = res_block(x, rp)
    x = conv_block(x, params["conv4"], stride=2, padding=1)
    for rp in params["res3"]:
        x = res_block(x, rp)
    x = conv_block(x, params["conv5"], stride=2, padding=1)
    for rp in params["res4"]:
        x = res_block(x, rp)
    x = conv_block(x, params["conv6"], stride=2, padding=1)
    for rp in params["res5"]:
        x = res_block(x, rp)
    # AdaptiveAvgPool2d((1,1)) + flatten (tiny reduction -> XLA glue).
    feat = jnp.mean(x.astype(jnp.float32), axis=(1, 2))
    # Classifier: (N, 1024) @ (1024, num_classes) is too small for a useful
    # pallas_call (masked lane-10 stores + fixed overhead); leave to XLA.
    return feat @ params["fc_w"] + params["fc_b"]


if __name__ == "__main__":
    key = jax.random.PRNGKey(0)
    kp, kx = jax.random.split(key)
    params = init_darknet53(kp, num_classes=10)
    # PyTorch-style NCHW input; channels must be 3 for Darknet53's first conv.
    x = jax.random.normal(kx, (2, 3, 16, 16), jnp.float32)
    logits = darknet53_forward(x, params)
    logits = jax.block_until_ready(logits)
    assert logits.shape == (2, 10), logits.shape
    assert bool(jnp.all(jnp.isfinite(logits)))
    print("KERNEL_OK")
</pallas_src>

<mosaic_0001>
module attributes {stable_mosaic.version = 11 : i64} {
  func.func @kernel(%arg0: i32, %arg1: i32, %arg2: memref<512x128xbf16, #tpu.memory_space<vmem>>, %arg3: memref<128x128xbf16, #tpu.memory_space<vmem>>, %arg4: memref<1x128xf32, #tpu.memory_space<vmem>>, %arg5: memref<1x128xf32, #tpu.memory_space<vmem>>, %arg6: memref<512x128xbf16, #tpu.memory_space<vmem>>, %arg7: memref<512x128xf32, #tpu.memory_space<vmem>>) attributes {dimension_semantics = [#tpu.dimension_semantics<parallel>, #tpu.dimension_semantics<arbitrary>], iteration_bounds = array<i64: 1, 1>, scalar_prefetch = 0 : i64, scratch_operands = 1 : i64, tpu.core_type = #tpu.core_type<tc>, window_params = [{transform_indices = @transform_0, window_bounds = array<i64: 512, 128>}, {transform_indices = @transform_1, window_bounds = array<i64: 128, 128>}, {transform_indices = @transform_2, window_bounds = array<i64: 1, 128>}, {transform_indices = @transform_3, window_bounds = array<i64: 1, 128>}, {transform_indices = @transform_4, window_bounds = array<i64: 512, 128>}]} {
    %c0_i32 = arith.constant 0 : i32
    %0 = arith.cmpi eq, %arg1, %c0_i32 : i32
    %1 = arith.extui %0 : i1 to i32
    %c0_i32_0 = arith.constant 0 : i32
    %2 = arith.cmpi ne, %1, %c0_i32_0 : i32
    scf.if %2 {
      %cst_10 = arith.constant 0.000000e+00 : f32
      %12 = vector.broadcast %cst_10 : f32 to vector<512x128xf32>
      %c0_11 = arith.constant 0 : index
      %c0_12 = arith.constant 0 : index
      %13 = vector.load %arg7[%c0_11, %c0_12] : memref<512x128xf32, #tpu.memory_space<vmem>>, vector<512x128xf32>
      tpu.vector_store %arg7[%c0_11, %c0_12], %12 {strides = array<i32>} : memref<512x128xf32, #tpu.memory_space<vmem>>, vector<512x128xf32>,
    } else {
    }
    %c0 = arith.constant 0 : index
    %c0_1 = arith.constant 0 : index
    %3 = vector.load %arg7[%c0, %c0_1] : memref<512x128xf32, #tpu.memory_space<vmem>>, vector<512x128xf32>
    %c0_2 = arith.constant 0 : index
    %c0_3 = arith.constant 0 : index
    %4 = vector.load %arg2[%c0_2, %c0_3] : memref<512x128xbf16, #tpu.memory_space<vmem>>, vector<512x128xbf16>
    %c0_4 = arith.constant 0 : index
    %c0_5 = arith.constant 0 : index
    %5 = vector.load %arg3[%c0_4, %c0_5] : memref<128x128xbf16, #tpu.memory_space<vmem>>, vector<128x128xbf16>
    %cst = arith.constant dense<0.000000e+00> : vector<512x128xf32>
    %6 = tpu.matmul %4, %5, %cst {dimension_numbers = #tpu.dot_dimension_numbers<[1], [0], [0], [1], [0, 0, 1, 1], [], []>} : vector<512x128xbf16>, vector<128x128xbf16>, vector<512x128xf32> -> vector<512x128xf32>
    %7 = arith.addf %3, %6 : vector<512x128xf32>
    %c0_6 = arith.constant 0 : index
    %c0_7 = arith.constant 0 : index
    %8 = vector.load %arg7[%c0_6, %c0_7] : memref<512x128xf32, #tpu.memory_space<vmem>>, vector<512x128xf32>
    tpu.vector_store %arg7[%c0_6, %c0_7], %7 {strides = array<i32>} : memref<512x128xf32, #tpu.memory_space<vmem>>, vector<512x128xf32>,
    %c0_i32_8 = arith.constant 0 : i32
    %9 = arith.cmpi eq, %arg1, %c0_i32_8 : i32
    %10 = arith.extui %9 : i1 to i32
    %c0_i32_9 = arith.constant 0 : i32
    %11 = arith.cmpi ne, %10, %c0_i32_9 : i32
    scf.if %11 {
      %c0_10 = arith.constant 0 : index
      %c0_11 = arith.constant 0 : index
      %12 = vector.load %arg7[%c0_10, %c0_11] : memref<512x128xf32, #tpu.memory_space<vmem>>, vector<512x128xf32>
      %c0_12 = arith.constant 0 : index
      %c0_13 = arith.constant 0 : index
      %13 = vector.load %arg4[%c0_12, %c0_13] : memref<1x128xf32, #tpu.memory_space<vmem>>, vector<1x128xf32>
      %c0_14 = arith.constant 0 : index
      %c0_15 = arith.constant 0 : index
      %14 = vector.load %arg5[%c0_14, %c0_15] : memref<1x128xf32, #tpu.memory_space<vmem>>, vector<1x128xf32>
      %cst_16 = arith.constant dense<0.000000e+00> : vector<128xf32>
      %15 = vector.multi_reduction <add>, %12, %cst_16 [0] : vector<512x128xf32> to vector<128xf32>
      %16 = vector.shape_cast %15 : vector<128xf32> to vector<1x128xf32>
      %cst_17 = arith.constant 0.001953125 : f32
      %17 = vector.broadcast %cst_17 : f32 to vector<1x128xf32>
      %18 = arith.mulf %16, %17 : vector<1x128xf32>
      %19 = arith.mulf %12, %12 : vector<512x128xf32>
      %cst_18 = arith.constant dense<0.000000e+00> : vector<128xf32>
      %20 = vector.multi_reduction <add>, %19, %cst_18 [0] : vector<512x128xf32> to vector<128xf32>
      %21 = vector.shape_cast %20 : vector<128xf32> to vector<1x128xf32>
      %cst_19 = arith.constant 0.001953125 : f32
      %22 = vector.broadcast %cst_19 : f32 to vector<1x128xf32>
      %23 = arith.mulf %21, %22 : vector<1x128xf32>
      %24 = arith.mulf %18, %18 : vector<1x128xf32>
      %25 = arith.subf %23, %24 : vector<1x128xf32>
      %cst_20 = arith.constant 0.000000e+00 : f32
      %26 = vector.broadcast %cst_20 : f32 to vector<1x128xf32>
      %27 = arith.maximumf %25, %26 : vector<1x128xf32>
      %cst_21 = arith.constant 9.99999974E-6 : f32
      %28 = vector.broadcast %cst_21 : f32 to vector<1x128xf32>
      %29 = arith.addf %27, %28 : vector<1x128xf32>
      %30 = math.rsqrt %29 : vector<1x128xf32>
      %31 = arith.mulf %13, %30 : vector<1x128xf32>
      %32 = arith.mulf %18, %31 : vector<1x128xf32>
      %33 = arith.subf %14, %32 : vector<1x128xf32>
      %34 = vector.broadcast %31 : vector<1x128xf32> to vector<512x128xf32>
      %35 = arith.mulf %12, %34 : vector<512x128xf32>
      %36 = vector.broadcast %33 : vector<1x128xf32> to vector<512x128xf32>
      %37 = arith.addf %35, %36 : vector<512x128xf32>
      %cst_22 = arith.constant 0.000000e+00 : f32
      %38 = vector.broadcast %cst_22 : f32 to vector<512x128xf32>
      %39 = arith.cmpf oge, %37, %38 : vector<512x128xf32>
      %cst_23 = arith.constant 1.000000e-01 : f32
      %40 = vector.broadcast %cst_23 : f32 to vector<512x128xf32>
      %41 = arith.mulf %40, %37 : vector<512x128xf32>
      %42 = arith.select %39, %37, %41 : vector<512x128xi1>, vector<512x128xf32>
      %43 = arith.truncf %42 : vector<512x128xf32> to vector<512x128xbf16>
      %c0_24 = arith.constant 0 : index
      %c0_25 = arith.constant 0 : index
      %44 = vector.load %arg6[%c0_24, %c0_25] : memref<512x128xbf16, #tpu.memory_space<vmem>>, vector<512x128xbf16>
      tpu.vector_store %arg6[%c0_24, %c0_25], %43 {strides = array<i32>} : memref<512x128xbf16, #tpu.memory_space<vmem>>, vector<512x128xbf16>,
    } else {
    }
    return
  }
  func.func @transform_0(%arg0: i32, %arg1: i32) -> (i32, i32) {
    %c0_i32 = arith.constant 0 : i32
    %c0_i32_0 = arith.constant 0 : i32
    return %c0_i32, %arg1 : i32, i32
  }
  func.func @transform_1(%arg0: i32, %arg1: i32) -> (i32, i32) {
    %c0_i32 = arith.constant 0 : i32
    return %arg1, %arg0 : i32, i32
  }
  func.func @transform_2(%arg0: i32, %arg1: i32) -> (i32, i32) {
    %c0_i32 = arith.constant 0 : i32
    %c0_i32_0 = arith.constant 0 : i32
    return %c0_i32, %arg0 : i32, i32
  }
  func.func @transform_3(%arg0: i32, %arg1: i32) -> (i32, i32) {
    %c0_i32 = arith.constant 0 : i32
    %c0_i32_0 = arith.constant 0 : i32
    return %c0_i32, %arg0 : i32, i32
  }
  func.func @transform_4(%arg0: i32, %arg1: i32) -> (i32, i32) {
    %c0_i32 = arith.constant 0 : i32
    %c0_i32_0 = arith.constant 0 : i32
    return %c0_i32, %arg0 : i32, i32
  }
}

</mosaic_0001>

<bundles_post_ra>
// kernel: _conv_bn_leaky.1
= control target key start
LH: loop header
LB: loop body
LE: loop exit
PB: predicated region body
PF: predicated region fallthrough
CT: control target
= control target key end

     0   :  { %s4101_s1 = inlined_call_operand.vmem [shape: bf16[128,128], index: 1, kind: input, shape index: {}]   ;;  %s4102_s0 = inlined_call_operand.vmem [shape: bf16[512,128], index: 0, kind: input, shape index: {}]   ;;  %s4103_s2 = inlined_call_operand.vmem [shape: f32[1,128], index: 2, kind: input, shape index: {}]   ;;  %s4104_s3 = inlined_call_operand.vmem [shape: f32[1,128], index: 3, kind: input, shape index: {}]   ;;  %s4105_s4 = inlined_call_operand.vmem [shape: bf16[512,128], index: 4, kind: output, shape index: {}]  }
   0x1   :  { %v2319_v0 = vld [vmem:[%s4101_s1] sm:$0xff]   ;;  %v2320_v1 = vld [vmem:[%s4101_s1 + $0x8] sm:$0xff]   ;;  %v2321_v2 = vld [vmem:[%s4101_s1 + $0x10] sm:$0xff]  }
   0x2   :  { %2223 = vmatprep.subr.bf16.mxu0 %v2319_v0  ;;  %2303 = vmatprep.subr.bf16.mxu1 %v2319_v0  ;;  %v2322_v3 = vld [vmem:[%s4101_s1 + $0x18] sm:$0xff]   ;;  %v2327_v4 = vld [vmem:[%s4102_s0] sm:$0xff]   ;;  %v2324_v6 = vld [vmem:[%s4101_s1 + $0x28] sm:$0xff]  }
   0x3   :  { %2224 = vmatpush3.bf16.msra.mxu0 %v2319_v0  ;;  %2311 = vmatpush3.bf16.msra.mxu1 %v2319_v0  ;;  %v2323_v5 = vld [vmem:[%s4101_s1 + $0x20] sm:$0xff]   ;;  %v2325_v7 = vld [vmem:[%s4101_s1 + $0x30] sm:$0xff]   ;;  %v2326_v8 = vld [vmem:[%s4101_s1 + $0x38] sm:$0xff]  }
   0x4   :  { %2225 = vmatprep.subr.bf16.mxu0 %v2320_v1  ;;  %2304 = vmatprep.subr.bf16.mxu1 %v2320_v1  ;;  %v2343_v9 = vld [vmem:[%s4102_s0 + $0x80] sm:$0xff]   ;;  %v2328_v10 = vld [vmem:[%s4102_s0 + $0x8] sm:$0xff]   ;;  %v2329_v11 = vld [vmem:[%s4102_s0 + $0x10] sm:$0xff]  }
   0x5   :  { %2239 = vmatprep.mubr.bf16.mxu0 %v2327_v4  ;;  %2271 = vmatprep.mubr.bf16.mxu1 %v2343_v9  ;;  %v2344_v12 = vld [vmem:[%s4102_s0 + $0x88] sm:$0xff]   ;;  %v2345_v13 = vld [vmem:[%s4102_s0 + $0x90] sm:$0xff]   ;;  %v2330_v14 = vld [vmem:[%s4102_s0 + $0x18] sm:$0xff]  }
   0x6   :  { %v2331_v15 = vld [vmem:[%s4102_s0 + $0x20] sm:$0xff]   ;;  %v2346_v16 = vld [vmem:[%s4102_s0 + $0x98] sm:$0xff]   ;;  %v2332_v18 = vld [vmem:[%s4102_s0 + $0x28] sm:$0xff]  }
   0x7   :  { %2226 = vmatpush3.bf16.msra.mxu0 %v2320_v1  ;;  %2312 = vmatpush3.bf16.msra.mxu1 %v2320_v1  ;;  %v2347_v17 = vld [vmem:[%s4102_s0 + $0xa0] sm:$0xff]   ;;  %v2348_v19 = vld [vmem:[%s4102_s0 + $0xa8] sm:$0xff]   ;;  %v2333_v20 = vld [vmem:[%s4102_s0 + $0x30] sm:$0xff]  }
   0x8   :  { %2227 = vmatprep.subr.bf16.mxu0 %v2321_v2  ;;  %2305 = vmatprep.subr.bf16.mxu1 %v2321_v2  ;;  %v2349_v21 = vld [vmem:[%s4102_s0 + $0xb0] sm:$0xff]   ;;  %v2334_v22 = vld [vmem:[%s4102_s0 + $0x38] sm:$0xff]   ;;  %v2335_v24 = vld [vmem:[%s4102_s0 + $0x40] sm:$0xff]  }
   0x9   :  { %v2350_v23 = vld [vmem:[%s4102_s0 + $0xb8] sm:$0xff]   ;;  %v2351_v25 = vld [vmem:[%s4102_s0 + $0xc0] sm:$0xff]   ;;  %v2336_v26 = vld [vmem:[%s4102_s0 + $0x48] sm:$0xff]  }
   0xa   :  { %v2352_v27 = vld [vmem:[%s4102_s0 + $0xc8] sm:$0xff]   ;;  %v2337_v28 = vld [vmem:[%s4102_s0 + $0x50] sm:$0xff]   ;;  %v2338_v30 = vld [vmem:[%s4102_s0 + $0x58] sm:$0xff]  }
   0xb   :  { %2228 = vmatpush3.bf16.msra.mxu0 %v2321_v2  ;;  %2313 = vmatpush3.bf16.msra.mxu1 %v2321_v2  ;;  %v2353_v29 = vld [vmem:[%s4102_s0 + $0xd0] sm:$0xff]   ;;  %v2354_v31 = vld [vmem:[%s4102_s0 + $0xd8] sm:$0xff]   ;;  %v2339_v32 = vld [vmem:[%s4102_s0 + $0x60] sm:$0xff]  }
   0xc   :  { %2229 = vmatprep.subr.bf16.mxu0 %v2322_v3  ;;  %2306 = vmatprep.subr.bf16.mxu1 %v2322_v3  ;;  %v2355_v33 = vld [vmem:[%s4102_s0 + $0xe0] sm:$0xff]   ;;  %v2340_v34 = vld [vmem:[%s4102_s0 + $0x68] sm:$0xff]   ;;  %v2341_v36 = vld [vmem:[%s4102_s0 + $0x70] sm:$0xff]  }
   0xd   :  { %v2356_v35 = vld [vmem:[%s4102_s0 + $0xe8] sm:$0xff]   ;;  %v2357_v37 = vld [vmem:[%s4102_s0 + $0xf0] sm:$0xff]   ;;  %v2342_v38 = vld [vmem:[%s4102_s0 + $0x78] sm:$0xff]  }
   0xe   :  { %v2358_v39 = vld [vmem:[%s4102_s0 + $0xf8] sm:$0xff]  }
   0xf   :  { %2230 = vmatpush3.bf16.msra.mxu0 %v2322_v3  ;;  %2314 = vmatpush3.bf16.msra.mxu1 %v2322_v3 }
  0x10   :  { %2231 = vmatprep.subr.bf16.mxu0 %v2323_v5  ;;  %2307 = vmatprep.subr.bf16.mxu1 %v2323_v5 }
  0x13   :  { %2232 = vmatpush3.bf16.msra.mxu0 %v2323_v5  ;;  %2315 = vmatpush3.bf16.msra.mxu1 %v2323_v5 }
  0x14   :  { %2233 = vmatprep.subr.bf16.mxu0 %v2324_v6  ;;  %2308 = vmatprep.subr.bf16.mxu1 %v2324_v6 }
  0x17   :  { %2234 = vmatpush3.bf16.msra.mxu0 %v2324_v6  ;;  %2316 = vmatpush3.bf16.msra.mxu1 %v2324_v6 }
  0x18   :  { %2235 = vmatprep.subr.bf16.mxu0 %v2325_v7  ;;  %2309 = vmatprep.subr.bf16.mxu1 %v2325_v7 }
  0x1b   :  { %2236 = vmatpush3.bf16.msra.mxu0 %v2325_v7  ;;  %2317 = vmatpush3.bf16.msra.mxu1 %v2325_v7 }
  0x1c   :  { %2237 = vmatprep.subr.bf16.mxu0 %v2326_v8  ;;  %2310 = vmatprep.subr.bf16.mxu1 %v2326_v8 }
  0x1f   :  { %2238 = vmatpush3.bf16.msra.mxu0 %v2326_v8  ;;  %2318 = vmatpush3.bf16.msra.mxu1 %v2326_v8 }
  0x22   :  { %2240 = vmatmul.mubr.bf16.vlgmr.msra.gmra.mrb[0].mxu0 %v2328_v10  ;;  %2272 = vmatmul.mubr.bf16.vlgmr.msra.gmra.mrb[0].mxu1 %v2344_v12 }
  0x23   :  { %2243 = vmatprep.mubr.bf16.mxu0 %v2329_v11  ;;  %2275 = vmatprep.mubr.bf16.mxu1 %v2345_v13 }
  0x2a   :  { %2244 = vmatmul.mubr.bf16.gmra.mrb[4].mxu0 %v2330_v14  ;;  %2276 = vmatmul.mubr.bf16.gmra.mrb[4].mxu1 %v2346_v16 }
  0x2b   :  { %2247 = vmatprep.mubr.bf16.mxu0 %v2331_v15  ;;  %2279 = vmatprep.mubr.bf16.mxu1 %v2347_v17 }
  0x32   :  { %2248 = vmatmul.mubr.bf16.gmra.mrb[8].mxu0 %v2332_v18  ;;  %2280 = vmatmul.mubr.bf16.gmra.mrb[8].mxu1 %v2348_v19 }
  0x33   :  { %2251 = vmatprep.mubr.bf16.mxu0 %v2333_v20  ;;  %2283 = vmatprep.mubr.bf16.mxu1 %v2349_v21 }
  0x3a   :  { %2252 = vmatmul.mubr.bf16.gmra.mrb[12].mxu0 %v2334_v22  ;;  %2284 = vmatmul.mubr.bf16.gmra.mrb[12].mxu1 %v2350_v23 }
  0x3b   :  { %2255 = vmatprep.mubr.bf16.mxu0 %v2335_v24  ;;  %2287 = vmatprep.mubr.bf16.mxu1 %v2351_v25 }
  0x42   :  { %2256 = vmatmul.mubr.bf16.gmra.mrb[16].mxu0 %v2336_v26  ;;  %2288 = vmatmul.mubr.bf16.gmra.mrb[16].mxu1 %v2352_v27 }
  0x43   :  { %2259 = vmatprep.mubr.bf16.mxu0 %v2337_v28  ;;  %2291 = vmatprep.mubr.bf16.mxu1 %v2353_v29 }
  0x4a   :  { %2260 = vmatmul.mubr.bf16.gmra.mrb[20].mxu0 %v2338_v30  ;;  %2292 = vmatmul.mubr.bf16.gmra.mrb[20].mxu1 %v2354_v31 }
  0x4b   :  { %2263 = vmatprep.mubr.bf16.mxu0 %v2339_v32  ;;  %2295 = vmatprep.mubr.bf16.mxu1 %v2355_v33 }
  0x52   :  { %2264 = vmatmul.mubr.bf16.gmra.mrb[24].mxu0 %v2340_v34  ;;  %2296 = vmatmul.mubr.bf16.gmra.mrb[24].mxu1 %v2356_v35 }
  0x53   :  { %2267 = vmatprep.mubr.bf16.mxu0 %v2341_v36  ;;  %2299 = vmatprep.mubr.bf16.mxu1 %v2357_v37 }
  0x5a   :  { %2268 = vmatmul.mubr.bf16.gmra.mrb[28].mxu0 %v2342_v38  ;;  %2300 = vmatmul.mubr.bf16.gmra.mrb[28].mxu1 %v2358_v39 }
  0xf5   :  { %v2506_v40 = vpop.f32.mrb[0].mxu0  ;;  %v2508_v41 = vpop.f32.mrb[0].mxu1 }
  0xf6   :  { %v2510_v42 = vpop.f32.mrb[1].mxu0  ;;  %v2512_v43 = vpop.f32.mrb[1].mxu1  ;;  %v1028_v51 = vmul.f32 %v2506_v40, %v2506_v40 }
  0xf7   :  { %v2514_v44 = vpop.f32.mrb[2].mxu0  ;;  %v2516_v45 = vpop.f32.mrb[2].mxu1  ;;  %v1026_v48 = vmul.f32 %v2510_v42, %v2510_v42 }
  0xf8   :  { %v2518_v46 = vpop.f32.mrb[3].mxu0  ;;  %v2520_v47 = vpop.f32.mrb[3].mxu1  ;;  %v1029_v54 = vmul.f32 %v2514_v44, %v2514_v44 }
  0xf9   :  { %v956_v49 = vadd.f32 %v2518_v46, %v2510_v42  ;;  %v1027_v50 = vmul.f32 %v2518_v46, %v2518_v46 }
  0xfb   :  { %v957_v52 = vadd.f32 %v2506_v40, %v956_v49  ;;  %v1090_v53 = vadd.f32 %v1027_v50, %v1026_v48 }
  0xfd   :  { %v1091_v55 = vadd.f32 %v1090_v53, %v1028_v51  ;;  %v2533_v56 = vpop.f32.mrb[4].mxu0  ;;  %v958_v57 = vadd.f32 %v2514_v44, %v957_v52  ;;  %v2536_v58 = vpop.f32.mrb[4].mxu1 }
  0xfe   :  { %v2538_v59 = vpop.f32.mrb[5].mxu0  ;;  %v2540_v60 = vpop.f32.mrb[5].mxu1  ;;  %v1032_v7 = vmul.f32 %v2533_v56, %v2533_v56 }
  0xff   :  { %v959_v61 = vadd.f32 %v958_v57, %v2538_v59  ;;  %v1030_v62 = vmul.f32 %v2538_v59, %v2538_v59  ;;  %v1092_v63 = vadd.f32 %v1091_v55, %v1029_v54  ;;  %v2545_v0 = vpop.f32.mrb[6].mxu0  ;;  %v2547_v1 = vpop.f32.mrb[6].mxu1 }
 0x100   :  { %v2549_v2 = vpop.f32.mrb[7].mxu0  ;;  %v2551_v3 = vpop.f32.mrb[7].mxu1  ;;  %v1033_v10 = vmul.f32 %v2545_v0, %v2545_v0 }
 0x101   :  { %v1093_v4 = vadd.f32 %v1092_v63, %v1030_v62  ;;  %v960_v5 = vadd.f32 %v959_v61, %v2549_v2  ;;  %v1031_v6 = vmul.f32 %v2549_v2, %v2549_v2 }
 0x103   :  { %v961_v8 = vadd.f32 %v2533_v56, %v960_v5  ;;  %v1094_v9 = vadd.f32 %v1093_v4, %v1031_v6 }
 0x105   :  { %v1095_v11 = vadd.f32 %v1094_v9, %v1032_v7  ;;  %v2561_v12 = vpop.f32.mrb[8].mxu0  ;;  %v962_v13 = vadd.f32 %v2545_v0, %v961_v8  ;;  %v2564_v14 = vpop.f32.mrb[8].mxu1 }
 0x106   :  { %v2566_v15 = vpop.f32.mrb[9].mxu0  ;;  %v2568_v16 = vpop.f32.mrb[9].mxu1  ;;  %v1036_v27 = vmul.f32 %v2561_v12, %v2561_v12 }
 0x107   :  { %v963_v17 = vadd.f32 %v962_v13, %v2566_v15  ;;  %v1034_v18 = vmul.f32 %v2566_v15, %v2566_v15  ;;  %v1096_v19 = vadd.f32 %v1095_v11, %v1033_v10  ;;  %v2573_v20 = vpop.f32.mrb[10].mxu0  ;;  %v2575_v21 = vpop.f32.mrb[10].mxu1 }
 0x108   :  { %v2577_v22 = vpop.f32.mrb[11].mxu0  ;;  %v2579_v23 = vpop.f32.mrb[11].mxu1  ;;  %v1037_v30 = vmul.f32 %v2573_v20, %v2573_v20 }
 0x109   :  { %v1097_v24 = vadd.f32 %v1096_v19, %v1034_v18  ;;  %v964_v25 = vadd.f32 %v963_v17, %v2577_v22  ;;  %v1035_v26 = vmul.f32 %v2577_v22, %v2577_v22 }
 0x10b   :  { %v965_v28 = vadd.f32 %v2561_v12, %v964_v25  ;;  %v1098_v29 = vadd.f32 %v1097_v24, %v1035_v26 }
 0x10d   :  { %v1099_v31 = vadd.f32 %v1098_v29, %v1036_v27  ;;  %v2589_v32 = vpop.f32.mrb[12].mxu0  ;;  %v966_v33 = vadd.f32 %v2573_v20, %v965_v28  ;;  %v2592_v34 = vpop.f32.mrb[12].mxu1 }
 0x10e   :  { %v2594_v35 = vpop.f32.mrb[13].mxu0  ;;  %v2596_v36 = vpop.f32.mrb[13].mxu1  ;;  %v1040_v55 = vmul.f32 %v2589_v32, %v2589_v32 }
 0x10f   :  { %v967_v37 = vadd.f32 %v966_v33, %v2594_v35  ;;  %v1038_v38 = vmul.f32 %v2594_v35, %v2594_v35  ;;  %v1100_v39 = vadd.f32 %v1099_v31, %v1037_v30  ;;  %v2601_v48 = vpop.f32.mrb[14].mxu0  ;;  %v2603_v49 = vpop.f32.mrb[14].mxu1 }
 0x110   :  { %4161 = vst [vmem:[#allocation3_spill] sm:$0xff] %v2601_v48  ;;  %v2605_v50 = vpop.f32.mrb[15].mxu0  ;;  %v2607_v51 = vpop.f32.mrb[15].mxu1  ;;  %v1041_v62 = vmul.f32 %v2601_v48, %v2601_v48 }
 0x111   :  { %v1101_v52 = vadd.f32 %v1100_v39, %v1038_v38  ;;  %v968_v53 = vadd.f32 %v967_v37, %v2605_v50  ;;  %v1039_v54 = vmul.f32 %v2605_v50, %v2605_v50 }
 0x113   :  { %v969_v57 = vadd.f32 %v2589_v32, %v968_v53  ;;  %v1102_v61 = vadd.f32 %v1101_v52, %v1039_v54 }
 0x115   :  { %v1103_v63 = vadd.f32 %v1102_v61, %v1040_v55  ;;  %v2617_v4 = vpop.f32.mrb[16].mxu0  ;;  %v970_v5 = vadd.f32 %v2601_v48, %v969_v57  ;;  %v2620_v6 = vpop.f32.mrb[16].mxu1  ;;  %v1059_v48 = vmul.f32 %v2520_v47, %v2520_v47 }
 0x116   :  { %4162 = vst [vmem:[#allocation4_spill] sm:$0xff] %v2617_v4  ;;  %v2622_v7 = vpop.f32.mrb[17].mxu0  ;;  %v2624_v8 = vpop.f32.mrb[17].mxu1  ;;  %v1044_v27 = vmul.f32 %v2617_v4, %v2617_v4 }
 0x117   :  { %4163 = vst [vmem:[#allocation5_spill] sm:$0xff] %v2622_v7  ;;  %v971_v9 = vadd.f32 %v970_v5, %v2622_v7  ;;  %v1042_v10 = vmul.f32 %v2622_v7, %v2622_v7  ;;  %v1104_v11 = vadd.f32 %v1103_v63, %v1041_v62  ;;  %v2629_v13 = vpop.f32.mrb[18].mxu0  ;;  %v2631_v17 = vpop.f32.mrb[18].mxu1 }
 0x118   :  { %4164 = vst [vmem:[#allocation6_spill] sm:$0xff] %v2629_v13  ;;  %v2633_v18 = vpop.f32.mrb[19].mxu0  ;;  %v2635_v19 = vpop.f32.mrb[19].mxu1  ;;  %v1045_v30 = vmul.f32 %v2629_v13, %v2629_v13 }
 0x119   :  { %4165 = vst [vmem:[#allocation7_spill] sm:$0xff] %v2633_v18  ;;  %v1105_v24 = vadd.f32 %v1104_v11, %v1042_v10  ;;  %v972_v25 = vadd.f32 %v971_v9, %v2633_v18  ;;  %v1043_v26 = vmul.f32 %v2633_v18, %v2633_v18 }
 0x11b   :  { %v973_v28 = vadd.f32 %v2617_v4, %v972_v25  ;;  %v1106_v29 = vadd.f32 %v1105_v24, %v1043_v26 }
 0x11d   :  { %v1107_v31 = vadd.f32 %v1106_v29, %v1044_v27  ;;  %v2645_v33 = vpop.f32.mrb[20].mxu0  ;;  %v974_v37 = vadd.f32 %v2629_v13, %v973_v28  ;;  %v2648_v38 = vpop.f32.mrb[20].mxu1 }
 0x11e   :  { %4166 = vst [vmem:[#allocation8_spill] sm:$0xff] %v2645_v33  ;;  %4167 = vst [vmem:[#allocation9_spill] sm:$0xff] %v2648_v38  ;;  %v2650_v39 = vpop.f32.mrb[21].mxu0  ;;  %v2652_v52 = vpop.f32.mrb[21].mxu1  ;;  %v1048_v11 = vmul.f32 %v2645_v33, %v2645_v33 }
 0x11f   :  { %4168 = vst [vmem:[#allocation10_spill] sm:$0xff] %v2650_v39  ;;  %v975_v53 = vadd.f32 %v974_v37, %v2650_v39  ;;  %v1046_v54 = vmul.f32 %v2650_v39, %v2650_v39  ;;  %v1108_v55 = vadd.f32 %v1107_v31, %v1045_v30  ;;  %v2657_v57 = vpop.f32.mrb[22].mxu0  ;;  %v2659_v61 = vpop.f32.mrb[22].mxu1 }
 0x120   :  { %4169 = vst [vmem:[#allocation11_spill] sm:$0xff] %v2657_v57  ;;  %4170 = vst [vmem:[#allocation12_spill] sm:$0xff] %v2659_v61  ;;  %v2661_v62 = vpop.f32.mrb[23].mxu0  ;;  %v2663_v63 = vpop.f32.mrb[23].mxu1  ;;  %v1049_v26 = vmul.f32 %v2657_v57, %v2657_v57 }
 0x121   :  { %4171 = vst [vmem:[#allocation13_spill] sm:$0xff] %v2661_v62  ;;  %v1109_v5 = vadd.f32 %v1108_v55, %v1046_v54  ;;  %v976_v9 = vadd.f32 %v975_v53, %v2661_v62  ;;  %v1047_v10 = vmul.f32 %v2661_v62, %v2661_v62 }
 0x123   :  { %v977_v24 = vadd.f32 %v2645_v33, %v976_v9  ;;  %v1110_v25 = vadd.f32 %v1109_v5, %v1047_v10 }
 0x125   :  { %v1111_v27 = vadd.f32 %v1110_v25, %v1048_v11  ;;  %v2673_v28 = vpop.f32.mrb[24].mxu0  ;;  %v978_v29 = vadd.f32 %v2657_v57, %v977_v24  ;;  %v2676_v30 = vpop.f32.mrb[24].mxu1 }
 0x126   :  { %4172 = vst [vmem:[#allocation14_spill] sm:$0xff] %v2673_v28  ;;  %4173 = vst [vmem:[#allocation15_spill] sm:$0xff] %v2676_v30  ;;  %v2678_v31 = vpop.f32.mrb[25].mxu0  ;;  %v2680_v37 = vpop.f32.mrb[25].mxu1 }
 0x127   :  { %4174 = vst [vmem:[#allocation16_spill] sm:$0xff] %v2678_v31  ;;  %4175 = vst [vmem:[#allocation17_spill] sm:$0xff] %v2680_v37  ;;  %v979_v53 = vadd.f32 %v978_v29, %v2678_v31  ;;  %v1050_v54 = vmul.f32 %v2678_v31, %v2678_v31  ;;  %v1112_v55 = vadd.f32 %v1111_v27, %v1049_v26  ;;  %v2685_v5 = vpop.f32.mrb[26].mxu0  ;;  %v2687_v9 = vpop.f32.mrb[26].mxu1 }
 0x128   :  { %4176 = vst [vmem:[#allocation18_spill] sm:$0xff] %v2685_v5  ;;  %4177 = vst [vmem:[#allocation19_spill] sm:$0xff] %v2687_v9  ;;  %v2689_v10 = vpop.f32.mrb[27].mxu0  ;;  %v2691_v11 = vpop.f32.mrb[27].mxu1  ;;  %v1052_v29 = vmul.f32 %v2673_v28, %v2673_v28  ;;  %v1053_v27 = vmul.f32 %v2685_v5, %v2685_v5 }
 0x129   :  { %4178 = vst [vmem:[#allocation20_spill] sm:$0xff] %v2689_v10  ;;  %4179 = vst [vmem:[#allocation21_spill] sm:$0xff] %v2691_v11  ;;  %v1113_v24 = vadd.f32 %v1112_v55, %v1050_v54  ;;  %v980_v25 = vadd.f32 %v979_v53, %v2689_v10  ;;  %v1051_v57 = vmul.f32 %v2689_v10, %v2689_v10 }
 0x12b   :  { %v981_v31 = vadd.f32 %v2673_v28, %v980_v25  ;;  %v1114_v26 = vadd.f32 %v1113_v24, %v1051_v57 }
 0x12d   :  { %v1115_v33 = vadd.f32 %v1114_v26, %v1052_v29  ;;  %v2701_v62 = vpop.f32.mrb[28].mxu0  ;;  %v982_v39 = vadd.f32 %v2685_v5, %v981_v31  ;;  %v2704_v54 = vpop.f32.mrb[28].mxu1 }
 0x12e   :  { %4180 = vst [vmem:[#allocation22_spill] sm:$0xff] %v2704_v54  ;;  %v2706_v53 = vpop.f32.mrb[29].mxu0  ;;  %v2708_v55 = vpop.f32.mrb[29].mxu1 }
 0x12f   :  { %4181 = vst [vmem:[#allocation23_spill] sm:$0xff] %v2706_v53  ;;  %4182 = vst [vmem:[#allocation24_spill] sm:$0xff] %v2708_v55  ;;  %v983_v10 = vadd.f32 %v982_v39, %v2706_v53  ;;  %v1054_v25 = vmul.f32 %v2706_v53, %v2706_v53  ;;  %v1116_v57 = vadd.f32 %v1115_v33, %v1053_v27  ;;  %v2713_v24 = vpop.f32.mrb[30].mxu0  ;;  %v2715_v28 = vpop.f32.mrb[30].mxu1 }
 0x130   :  { %v2717_v29 = vpop.f32.mrb[31].mxu0  ;;  %v2719_v26 = vpop.f32.mrb[31].mxu1  ;;  %v1056_v39 = vmul.f32 %v2701_v62, %v2701_v62  ;;  %v1057_v27 = vmul.f32 %v2713_v24, %v2713_v24 }
 0x131   :  { %4183 = vst [vmem:[#allocation25_spill] sm:$0xff] %v2717_v29  ;;  %4184 = vst [vmem:[#allocation26_spill] sm:$0xff] %v2719_v26  ;;  %v1117_v31 = vadd.f32 %v1116_v57, %v1054_v25  ;;  %v984_v5 = vadd.f32 %v983_v10, %v2717_v29  ;;  %v1055_v13 = vmul.f32 %v2717_v29, %v2717_v29 }
 0x132   :  { %v1058_v25 = vmul.f32 %v2512_v43, %v2512_v43 }
 0x133   :  { %v985_v53 = vadd.f32 %v2701_v62, %v984_v5  ;;  %v1118_v33 = vadd.f32 %v1117_v31, %v1055_v13  ;;  %v1060_v13 = vmul.f32 %v2508_v41, %v2508_v41 }
 0x135   :  { %v1119_v4 = vadd.f32 %v1118_v33, %v1056_v39  ;;  %v986_v18 = vadd.f32 %v2713_v24, %v985_v53  ;;  %v1061_v53 = vmul.f32 %v2516_v45, %v2516_v45 }
 0x137   :  { %v987_v10 = vadd.f32 %v986_v18, %v2512_v43  ;;  %v1120_v57 = vadd.f32 %v1119_v4, %v1057_v27  ;;  %v1062_v4 = vmul.f32 %v2540_v60, %v2540_v60 }
 0x139   :  { %v1121_v7 = vadd.f32 %v1120_v57, %v1058_v25  ;;  %v988_v29 = vadd.f32 %v987_v10, %v2520_v47  ;;  %v1063_v57 = vmul.f32 %v2551_v3, %v2551_v3 }
 0x13b   :  { %v989_v5 = vadd.f32 %v2508_v41, %v988_v29  ;;  %v1122_v31 = vadd.f32 %v1121_v7, %v1059_v48  ;;  %v1064_v48 = vmul.f32 %v2536_v58, %v2536_v58 }
 0x13d   :  { %v1123_v39 = vadd.f32 %v1122_v31, %v1060_v13  ;;  %v990_v33 = vadd.f32 %v2516_v45, %v989_v5  ;;  %v1065_v13 = vmul.f32 %v2547_v1, %v2547_v1 }
 0x13f   :  { %v991_v18 = vadd.f32 %v990_v33, %v2540_v60  ;;  %v1124_v27 = vadd.f32 %v1123_v39, %v1061_v53  ;;  %v1066_v53 = vmul.f32 %v2568_v16, %v2568_v16 }
 0x141   :  { %v1125_v25 = vadd.f32 %v1124_v27, %v1062_v4  ;;  %v992_v10 = vadd.f32 %v991_v18, %v2551_v3  ;;  %v1067_v27 = vmul.f32 %v2579_v23, %v2579_v23 }
 0x143   :  { %v993_v7 = vadd.f32 %v2536_v58, %v992_v10  ;;  %v1126_v29 = vadd.f32 %v1125_v25, %v1063_v57  ;;  %v1068_v25 = vmul.f32 %v2564_v14, %v2564_v14 }
 0x145   :  { %v1127_v5 = vadd.f32 %v1126_v29, %v1064_v48  ;;  %v994_v31 = vadd.f32 %v2547_v1, %v993_v7  ;;  %v1069_v48 = vmul.f32 %v2575_v21, %v2575_v21 }
 0x147   :  { %v995_v39 = vadd.f32 %v994_v31, %v2568_v16  ;;  %v1128_v33 = vadd.f32 %v1127_v5, %v1065_v13  ;;  %v1070_v13 = vmul.f32 %v2596_v36, %v2596_v36 }
 0x149   :  { %v1129_v4 = vadd.f32 %v1128_v33, %v1066_v53  ;;  %v996_v18 = vadd.f32 %v995_v39, %v2579_v23  ;;  %v1071_v33 = vmul.f32 %v2607_v51, %v2607_v51 }
 0x14b   :  { %v997_v10 = vadd.f32 %v2564_v14, %v996_v18  ;;  %v1130_v57 = vadd.f32 %v1129_v4, %v1067_v27  ;;  %v1072_v4 = vmul.f32 %v2592_v34, %v2592_v34 }
 0x14d   :  { %v1131_v7 = vadd.f32 %v1130_v57, %v1068_v25  ;;  %v998_v29 = vadd.f32 %v2575_v21, %v997_v10  ;;  %v1073_v25 = vmul.f32 %v2603_v49, %v2603_v49 }
 0x14f   :  { %v999_v5 = vadd.f32 %v998_v29, %v2596_v36  ;;  %v1132_v31 = vadd.f32 %v1131_v7, %v1069_v48  ;;  %v1074_v48 = vmul.f32 %v2624_v8, %v2624_v8 }
 0x151   :  { %v1133_v53 = vadd.f32 %v1132_v31, %v1070_v13  ;;  %v1000_v39 = vadd.f32 %v999_v5, %v2607_v51  ;;  %v1075_v31 = vmul.f32 %v2635_v19, %v2635_v19 }
 0x153   :  { %v1001_v18 = vadd.f32 %v2592_v34, %v1000_v39  ;;  %v1134_v27 = vadd.f32 %v1133_v53, %v1071_v33  ;;  %v1076_v53 = vmul.f32 %v2620_v6, %v2620_v6 }
 0x155   :  { %v1135_v10 = vadd.f32 %v1134_v27, %v1072_v4  ;;  %v1002_v57 = vadd.f32 %v2603_v49, %v1001_v18  ;;  %v1077_v4 = vmul.f32 %v2631_v17, %v2631_v17 }
 0x157   :  { %v1003_v7 = vadd.f32 %v1002_v57, %v2624_v8  ;;  %v1136_v29 = vadd.f32 %v1135_v10, %v1073_v25  ;;  %v1078_v25 = vmul.f32 %v2652_v52, %v2652_v52 }
 0x159   :  { %v1137_v13 = vadd.f32 %v1136_v29, %v1074_v48  ;;  %v1004_v5 = vadd.f32 %v1003_v7, %v2635_v19  ;;  %v1079_v29 = vmul.f32 %v2663_v63, %v2663_v63 }
 0x15b   :  { %v1005_v39 = vadd.f32 %v2620_v6, %v1004_v5  ;;  %v1138_v33 = vadd.f32 %v1137_v13, %v1075_v31  ;;  %v1080_v13 = vmul.f32 %v2648_v38, %v2648_v38 }
 0x15d   :  { %v1139_v18 = vadd.f32 %v1138_v33, %v1076_v53  ;;  %v1006_v27 = vadd.f32 %v2631_v17, %v1005_v39  ;;  %v1081_v53 = vmul.f32 %v2659_v61, %v2659_v61 }
 0x15f   :  { %v1007_v10 = vadd.f32 %v1006_v27, %v2652_v52  ;;  %v1140_v57 = vadd.f32 %v1139_v18, %v1077_v4  ;;  %v1082_v4 = vmul.f32 %v2680_v37, %v2680_v37 }
 0x161   :  { %v1141_v48 = vadd.f32 %v1140_v57, %v1078_v25  ;;  %v1008_v7 = vadd.f32 %v1007_v10, %v2663_v63  ;;  %v1083_v57 = vmul.f32 %v2691_v11, %v2691_v11 }
 0x163   :  { %v1009_v5 = vadd.f32 %v2648_v38, %v1008_v7  ;;  %v1142_v31 = vadd.f32 %v1141_v48, %v1079_v29  ;;  %v1084_v48 = vmul.f32 %v2676_v30, %v2676_v30 }
 0x165   :  { %v1143_v39 = vadd.f32 %v1142_v31, %v1080_v13  ;;  %v1010_v33 = vadd.f32 %v2659_v61, %v1009_v5  ;;  %v1085_v13 = vmul.f32 %v2687_v9, %v2687_v9 }
 0x167   :  { %v1011_v18 = vadd.f32 %v1010_v33, %v2680_v37  ;;  %v1144_v27 = vadd.f32 %v1143_v39, %v1081_v53  ;;  %v1086_v53 = vmul.f32 %v2708_v55, %v2708_v55 }
 0x169   :  { %v1145_v25 = vadd.f32 %v1144_v27, %v1082_v4  ;;  %v1012_v10 = vadd.f32 %v1011_v18, %v2691_v11  ;;  %v1087_v27 = vmul.f32 %v2719_v26, %v2719_v26 }
 0x16b   :  { %v1013_v7 = vadd.f32 %v2676_v30, %v1012_v10  ;;  %v1146_v29 = vadd.f32 %v1145_v25, %v1083_v57  ;;  %v1088_v25 = vmul.f32 %v2704_v54, %v2704_v54 }
 0x16d   :  { %v1147_v5 = vadd.f32 %v1146_v29, %v1084_v48  ;;  %v1014_v31 = vadd.f32 %v2687_v9, %v1013_v7  ;;  %v1089_v48 = vmul.f32 %v2715_v28, %v2715_v28 }
 0x16f   :  { %v1015_v39 = vadd.f32 %v1014_v31, %v2708_v55  ;;  %v1148_v33 = vadd.f32 %v1147_v5, %v1085_v13 }
 0x171   :  { %v1149_v4 = vadd.f32 %v1148_v33, %v1086_v53  ;;  %v1016_v18 = vadd.f32 %v1015_v39, %v2719_v26 }
 0x173   :  { %v1017_v10 = vadd.f32 %v2704_v54, %v1016_v18  ;;  %v1150_v57 = vadd.f32 %v1149_v4, %v1087_v27 }
 0x175   :  { %v1018_v7 = vadd.f32 %v2715_v28, %v1017_v10  ;;  %v1151_v29 = vadd.f32 %v1150_v57, %v1088_v25  ;;  %v1169_v25 = vlaneseq }
 0x177   :  { %v1019_v31 = vrot.slane %v1018_v7, 4  ;;  %v1152_v13 = vadd.f32 %v1151_v29, %v1089_v48  ;;  %v2826_v57 = vshrl.u32 %v1169_v25, 7  ;;  %v954_v48 = vld [vmem:[%s4103_s2] sm:$0x1]  ;;  %v4192_v25 = vld [vmem:[#allocation8_spill] sm:$0xff] }
 0x179   :  { %v1020_v5 = vadd.f32 %v1019_v31, %v1018_v7  ;;  %v1153_v53 = vrot.slane %v1152_v13, 4  ;;  %v4130_v7 = vsub.s32 0, %v2826_v57 }
 0x17b   :  { %v1021_v39 = vrot.slane %v1020_v5, 2  ;;  %v1154_v33 = vadd.f32 %v1153_v53, %v1152_v13  ;;  %v4185_v13 = vld [vmem:[#allocation3_spill] sm:$0xff] }
 0x17c   :  { %v4187_v53 = vld [vmem:[#allocation7_spill] sm:$0xff] }
 0x17d   :  { %v1022_v55 = vadd.f32 %v1021_v39, %v1020_v5  ;;  %v1155_v26 = vrot.slane %v1154_v33, 2  ;;  %v4186_v5 = vld [vmem:[#allocation5_spill] sm:$0xff]  ;;  %v4188_v39 = vld [vmem:[#allocation4_spill] sm:$0xff] }
 0x17f   :  { %v1023_v9 = vrot.slane %v1022_v55, 1  ;;  %v1156_v30 = vadd.f32 %v1155_v26, %v1154_v33  ;;  %v4189_v33 = vld [vmem:[#allocation6_spill] sm:$0xff] }
 0x181   :  { %v1024_v11 = vadd.f32 %v1023_v9, %v1022_v55  ;;  %v1157_v37 = vrot.slane %v1156_v30, 1 }
 0x183   :  { %v1025_v18 = vmul.f32 0.001953125, %v1024_v11  ;;  %v1158_v4 = vadd.f32 %v1157_v37, %v1156_v30  ;;  %v2835_v30 = vld [vmem:[%s4104_s3] sm:$0x1] }
 0x185   :  { %v1159_v27 = vmul.f32 0.001953125, %v1158_v4  ;;  %v1160_v54 = vmul.f32 %v1025_v18, %v1025_v18 }
 0x187   :  { %v1161_v61 = vsub.f32 %v1159_v27, %v1160_v54  ;;  %v4191_v27 = vld [vmem:[#allocation13_spill] sm:$0xff] }
 0x189   :  { %v1162_v38 = vmax.f32 %v1161_v61, 0.0  ;;  %v4198_v61 = vld [vmem:[#allocation23_spill] sm:$0xff] }
 0x18b   :  { %v1163_v10 = vadd.f32 1e-05, %v1162_v38 }
 0x18d   :  { %2359 = vrsqrt.f32 %v1163_v10 }
 0x197   :  { %v2360_v26 = vpop.eup %2359 }
 0x198   :  { %v1165_v9 = vmul.f32 %v2360_v26, %v954_v48  ;;  %v4193_v26 = vld [vmem:[#allocation11_spill] sm:$0xff] }
 0x19a   :  { %v2837_v37 = vmul.f32 %v1165_v9, %v1025_v18  ;;  %v2841_v38 = vrot.slane %v1165_v9, %v4130_v7  ;;  %v4190_v18 = vld [vmem:[#allocation10_spill] sm:$0xff]  ;;  %v4199_v7 = vld [vmem:[#allocation25_spill] sm:$0xff] }
 0x19c   :  { %v2847_v11 = vmul.f32 %v2841_v38, %v2510_v42  ;;  %v2851_v54 = vmul.f32 %v2841_v38, %v2518_v46  ;;  %v2855_v55 = vmul.f32 %v2506_v40, %v2841_v38  ;;  %v2859_v29 = vmul.f32 %v2514_v44, %v2841_v38 }
 0x19d   :  { %v2863_v31 = vmul.f32 %v2841_v38, %v2538_v59  ;;  %v2867_v42 = vmul.f32 %v2841_v38, %v2549_v2  ;;  %v2871_v46 = vmul.f32 %v2533_v56, %v2841_v38  ;;  %v2875_v40 = vmul.f32 %v2545_v0, %v2841_v38 }
 0x19e   :  { %v2879_v44 = vmul.f32 %v2841_v38, %v2566_v15  ;;  %v2883_v59 = vmul.f32 %v2841_v38, %v2577_v22  ;;  %v2887_v2 = vmul.f32 %v2561_v12, %v2841_v38  ;;  %v2891_v56 = vmul.f32 %v2573_v20, %v2841_v38 }
 0x19f   :  { %v2895_v0 = vmul.f32 %v2841_v38, %v2594_v35  ;;  %v2899_v15 = vmul.f32 %v2841_v38, %v2605_v50  ;;  %v2903_v22 = vmul.f32 %v2589_v32, %v2841_v38  ;;  %v2907_v12 = vmul.f32 %v4185_v13, %v2841_v38  ;;  %v4194_v13 = vld [vmem:[#allocation16_spill] sm:$0xff] }
 0x1a0   :  { %v2911_v20 = vmul.f32 %v2841_v38, %v4186_v5  ;;  %v2915_v35 = vmul.f32 %v2841_v38, %v4187_v53  ;;  %v2919_v50 = vmul.f32 %v4188_v39, %v2841_v38  ;;  %v2923_v32 = vmul.f32 %v4189_v33, %v2841_v38  ;;  %v4195_v53 = vld [vmem:[#allocation20_spill] sm:$0xff]  ;;  %v4196_v33 = vld [vmem:[#allocation14_spill] sm:$0xff] }
 0x1a1   :  { %v2927_v4 = vmul.f32 %v2841_v38, %v4190_v18  ;;  %v2931_v10 = vmul.f32 %v2841_v38, %v4191_v27  ;;  %v2935_v48 = vmul.f32 %v4192_v25, %v2841_v38  ;;  %v2939_v9 = vmul.f32 %v4193_v26, %v2841_v38  ;;  %v4197_v27 = vld [vmem:[#allocation18_spill] sm:$0xff] }
 0x1a2   :  { %v2943_v5 = vmul.f32 %v2841_v38, %v4194_v13  ;;  %v2947_v39 = vmul.f32 %v2841_v38, %v4195_v53  ;;  %v2951_v18 = vmul.f32 %v4196_v33, %v2841_v38  ;;  %v2955_v25 = vmul.f32 %v4197_v27, %v2841_v38 }
 0x1a3   :  { %v2959_v26 = vmul.f32 %v2841_v38, %v4198_v61  ;;  %v2963_v13 = vmul.f32 %v2841_v38, %v4199_v7  ;;  %v2967_v53 = vmul.f32 %v2701_v62, %v2841_v38  ;;  %v2971_v33 = vmul.f32 %v2713_v24, %v2841_v38 }
 0x1a4   :  { %v2975_v27 = vmul.f32 %v2841_v38, %v2512_v43  ;;  %v2979_v61 = vmul.f32 %v2841_v38, %v2520_v47  ;;  %v2983_v7 = vmul.f32 %v2508_v41, %v2841_v38  ;;  %v2987_v62 = vmul.f32 %v2516_v45, %v2841_v38 }
 0x1a5   :  { %v2991_v24 = vmul.f32 %v2841_v38, %v2540_v60  ;;  %v2995_v43 = vmul.f32 %v2841_v38, %v2551_v3  ;;  %v2999_v47 = vmul.f32 %v2536_v58, %v2841_v38  ;;  %v3003_v41 = vmul.f32 %v2547_v1, %v2841_v38 }
 0x1a6   :  { %v3007_v45 = vmul.f32 %v2841_v38, %v2568_v16  ;;  %v3011_v60 = vmul.f32 %v2841_v38, %v2579_v23  ;;  %v3015_v3 = vmul.f32 %v2564_v14, %v2841_v38  ;;  %v3019_v58 = vmul.f32 %v2575_v21, %v2841_v38 }
 0x1a7   :  { %v3023_v1 = vmul.f32 %v2841_v38, %v2596_v36  ;;  %v3027_v16 = vmul.f32 %v2841_v38, %v2607_v51  ;;  %v3031_v23 = vmul.f32 %v2592_v34, %v2841_v38  ;;  %v3035_v14 = vmul.f32 %v2603_v49, %v2841_v38 }
 0x1a8   :  { %v3039_v21 = vmul.f32 %v2841_v38, %v2624_v8  ;;  %v3043_v36 = vmul.f32 %v2841_v38, %v2635_v19  ;;  %v3047_v51 = vmul.f32 %v2620_v6, %v2841_v38  ;;  %v3051_v34 = vmul.f32 %v2631_v17, %v2841_v38 }
 0x1a9   :  { %v3055_v49 = vmul.f32 %v2841_v38, %v2652_v52  ;;  %v3059_v8 = vmul.f32 %v2841_v38, %v2663_v63 }
 0x1aa   :  { %4200 = vst [vmem:[#allocation3_spill] sm:$0xff] %v3039_v21  ;;  %4201 = vst [vmem:[#allocation5_spill] sm:$0xff] %v3043_v36  ;;  %v4206_v21 = vld [vmem:[#allocation9_spill] sm:$0xff]  ;;  %v4208_v36 = vld [vmem:[#allocation12_spill] sm:$0xff] }
 0x1ab   :  { %4202 = vst [vmem:[#allocation7_spill] sm:$0xff] %v3047_v51  ;;  %4203 = vst [vmem:[#allocation4_spill] sm:$0xff] %v3051_v34  ;;  %v3063_v19 = vmul.f32 %v4206_v21, %v2841_v38  ;;  %v3067_v6 = vmul.f32 %v4208_v36, %v2841_v38  ;;  %v4210_v51 = vld [vmem:[#allocation17_spill] sm:$0xff] }
 0x1ac   :  { %4204 = vst [vmem:[#allocation6_spill] sm:$0xff] %v3055_v49  ;;  %4205 = vst [vmem:[#allocation10_spill] sm:$0xff] %v3059_v8  ;;  %v3071_v17 = vmul.f32 %v2841_v38, %v4210_v51  ;;  %v4212_v34 = vld [vmem:[#allocation21_spill] sm:$0xff]  ;;  %v4213_v49 = vld [vmem:[#allocation15_spill] sm:$0xff] }
 0x1ad   :  { %4207 = vst [vmem:[#allocation13_spill] sm:$0xff] %v3063_v19  ;;  %4209 = vst [vmem:[#allocation8_spill] sm:$0xff] %v3067_v6  ;;  %v3075_v52 = vmul.f32 %v2841_v38, %v4212_v34  ;;  %v3079_v63 = vmul.f32 %v4213_v49, %v2841_v38  ;;  %v4215_v8 = vld [vmem:[#allocation19_spill] sm:$0xff]  ;;  %v4217_v19 = vld [vmem:[#allocation24_spill] sm:$0xff]  ;;  %v3099_v49 = vmul.f32 %v2715_v28, %v2841_v38 }
 0x1ae   :  { %4211 = vst [vmem:[#allocation11_spill] sm:$0xff] %v3071_v17  ;;  %v3083_v21 = vmul.f32 %v4215_v8, %v2841_v38  ;;  %v3087_v36 = vmul.f32 %v2841_v38, %v4217_v19  ;;  %v4218_v6 = vld [vmem:[#allocation26_spill] sm:$0xff]  ;;  %v4221_v8 = vsub.f32 %v2835_v30, %v2837_v37 }
 0x1af   :  { %4214 = vst [vmem:[#allocation16_spill] sm:$0xff] %v3079_v63  ;;  %v3091_v51 = vmul.f32 %v2841_v38, %v4218_v6  ;;  %v4219_v17 = vld [vmem:[#allocation22_spill] sm:$0xff]  ;;  %v4220_v63 = vsub.s32 0, %v2826_v57 }
 0x1b0   :  { %4216 = vst [vmem:[#allocation20_spill] sm:$0xff] %v3083_v21  ;;  %v3095_v34 = vmul.f32 %v4219_v17, %v2841_v38 }
 0x1b1   :  { %v3106_v21 = vrot.slane %v4221_v8, %v4220_v63 }
 0x1b2   :  { %v4229_v63 = vld [vmem:[#allocation4_spill] sm:$0xff] }
 0x1b3   :  { %v3110_v19 = vadd.f32 %v3106_v21, %v2847_v11  ;;  %v3114_v6 = vadd.f32 %v3106_v21, %v2851_v54  ;;  %v3118_v17 = vadd.f32 %v3106_v21, %v2855_v55  ;;  %v3122_v28 = vadd.f32 %v3106_v21, %v2859_v29  ;;  %v4231_v8 = vld [vmem:[#allocation6_spill] sm:$0xff] }
 0x1b4   :  { %v3126_v57 = vadd.f32 %v3106_v21, %v2863_v31  ;;  %v3130_v30 = vadd.f32 %v3106_v21, %v2867_v42  ;;  %v3134_v37 = vadd.f32 %v3106_v21, %v2871_v46  ;;  %v3138_v38 = vadd.f32 %v3106_v21, %v2875_v40 }
 0x1b5   :  { %v3142_v11 = vadd.f32 %v3106_v21, %v2879_v44  ;;  %v3146_v54 = vadd.f32 %v3106_v21, %v2883_v59  ;;  %v3150_v55 = vadd.f32 %v3106_v21, %v2887_v2  ;;  %v3154_v29 = vadd.f32 %v3106_v21, %v2891_v56 }
 0x1b6   :  { %v3158_v31 = vadd.f32 %v3106_v21, %v2895_v0  ;;  %v3162_v42 = vadd.f32 %v3106_v21, %v2899_v15  ;;  %v3166_v46 = vadd.f32 %v3106_v21, %v2903_v22  ;;  %v3170_v40 = vadd.f32 %v3106_v21, %v2907_v12 }
 0x1b7   :  { %v3174_v44 = vadd.f32 %v3106_v21, %v2911_v20  ;;  %v3178_v59 = vadd.f32 %v3106_v21, %v2915_v35  ;;  %v3182_v2 = vadd.f32 %v3106_v21, %v2919_v50  ;;  %v3186_v56 = vadd.f32 %v3106_v21, %v2923_v32 }
 0x1b8   :  { %v3190_v0 = vadd.f32 %v3106_v21, %v2927_v4  ;;  %v3194_v15 = vadd.f32 %v3106_v21, %v2931_v10  ;;  %v3198_v22 = vadd.f32 %v3106_v21, %v2935_v48  ;;  %v3202_v12 = vadd.f32 %v3106_v21, %v2939_v9 }
 0x1b9   :  { %v3206_v20 = vadd.f32 %v3106_v21, %v2943_v5  ;;  %v3210_v35 = vadd.f32 %v3106_v21, %v2947_v39  ;;  %v3214_v50 = vadd.f32 %v3106_v21, %v2951_v18  ;;  %v3218_v32 = vadd.f32 %v3106_v21, %v2955_v25 }
 0x1ba   :  { %v3222_v4 = vadd.f32 %v3106_v21, %v2959_v26  ;;  %v3226_v10 = vadd.f32 %v3106_v21, %v2963_v13  ;;  %v3230_v48 = vadd.f32 %v3106_v21, %v2967_v53  ;;  %v3234_v9 = vadd.f32 %v3106_v21, %v2971_v33 }
 0x1bb   :  { %v3238_v5 = vadd.f32 %v3106_v21, %v2975_v27  ;;  %v3242_v39 = vadd.f32 %v3106_v21, %v2979_v61  ;;  %v3246_v18 = vadd.f32 %v3106_v21, %v2983_v7  ;;  %v3250_v25 = vadd.f32 %v3106_v21, %v2987_v62 }
 0x1bc   :  { %v3254_v26 = vadd.f32 %v3106_v21, %v2991_v24  ;;  %v3258_v13 = vadd.f32 %v3106_v21, %v2995_v43  ;;  %v3262_v53 = vadd.f32 %v3106_v21, %v2999_v47  ;;  %v3266_v33 = vadd.f32 %v3106_v21, %v3003_v41 }
 0x1bd   :  { %v3270_v27 = vadd.f32 %v3106_v21, %v3007_v45  ;;  %v3274_v61 = vadd.f32 %v3106_v21, %v3011_v60  ;;  %v3278_v7 = vadd.f32 %v3106_v21, %v3015_v3  ;;  %v3282_v62 = vadd.f32 %v3106_v21, %v3019_v58  ;;  %v4223_v45 = vld [vmem:[#allocation3_spill] sm:$0xff]  ;;  %v4225_v3 = vld [vmem:[#allocation5_spill] sm:$0xff] }
 0x1be   :  { %v3286_v24 = vadd.f32 %v3106_v21, %v3023_v1  ;;  %v3290_v43 = vadd.f32 %v3106_v21, %v3027_v16  ;;  %v3294_v47 = vadd.f32 %v3106_v21, %v3031_v23  ;;  %v3298_v41 = vadd.f32 %v3106_v21, %v3035_v14  ;;  %v4227_v1 = vld [vmem:[#allocation7_spill] sm:$0xff] }
 0x1bf   :  { %v3302_v60 = vadd.f32 %v3106_v21, %v4223_v45  ;;  %v3306_v58 = vadd.f32 %v3106_v21, %v4225_v3  ;;  %v3310_v16 = vadd.f32 %v3106_v21, %v4227_v1  ;;  %v3314_v23 = vadd.f32 %v3106_v21, %v4229_v63 }
 0x1c0   :  { %4222 = vst [vmem:[#allocation14_spill] sm:$0xff] %v3298_v41  ;;  %v3318_v14 = vadd.f32 %v3106_v21, %v4231_v8  ;;  %v4233_v41 = vld [vmem:[#allocation10_spill] sm:$0xff]  ;;  %v3338_v8 = vadd.f32 %v3106_v21, %v3075_v52  ;;  %v3358_v52 = vadd.f32 %v3106_v21, %v3095_v34  ;;  %vm1308_vm0 = vcmp.ge.f32.partialorder %v3110_v19, 0.0 }
 0x1c1   :  { %4224 = vst [vmem:[#allocation18_spill] sm:$0xff] %v3302_v60  ;;  %4226 = vst [vmem:[#allocation23_spill] sm:$0xff] %v3306_v58  ;;  %v3322_v45 = vadd.f32 %v3106_v21, %v4233_v41  ;;  %v4235_v60 = vld [vmem:[#allocation13_spill] sm:$0xff]  ;;  %v4237_v58 = vld [vmem:[#allocation8_spill] sm:$0xff]  ;;  %vm1309_vm1 = vcmp.ge.f32.partialorder %v3114_v6, 0.0  ;;  %vm1310_vm2 = vcmp.ge.f32.partialorder %v3118_v17, 0.0 }
 0x1c2   :  { %4228 = vst [vmem:[#allocation25_spill] sm:$0xff] %v3310_v16  ;;  %4230 = vst [vmem:[#allocation9_spill] sm:$0xff] %v3314_v23  ;;  %v3326_v3 = vadd.f32 %v3106_v21, %v4235_v60  ;;  %v3330_v1 = vadd.f32 %v3106_v21, %v4237_v58  ;;  %v4239_v16 = vld [vmem:[#allocation11_spill] sm:$0xff]  ;;  %v3350_v58 = vadd.f32 %v3106_v21, %v3087_v36  ;;  %vm1311_vm3 = vcmp.ge.f32.partialorder %v3122_v28, 0.0 }
 0x1c3   :  { %4232 = vst [vmem:[#allocation12_spill] sm:$0xff] %v3318_v14  ;;  %4234 = vst [vmem:[#allocation17_spill] sm:$0xff] %v3322_v45  ;;  %v3334_v63 = vadd.f32 %v3106_v21, %v4239_v16  ;;  %v4242_v14 = vld [vmem:[#allocation16_spill] sm:$0xff]  ;;  %v3354_v16 = vadd.f32 %v3106_v21, %v3091_v51  ;;  %vm1312_vm4 = vcmp.ge.f32.partialorder %v3126_v57, 0.0  ;;  %vm1313_vm5 = vcmp.ge.f32.partialorder %v3130_v30, 0.0 }
 0x1c4   :  { %4236 = vst [vmem:[#allocation21_spill] sm:$0xff] %v3326_v3  ;;  %4238 = vst [vmem:[#allocation15_spill] sm:$0xff] %v3330_v1  ;;  %v3342_v41 = vadd.f32 %v3106_v21, %v4242_v14  ;;  %v4244_v45 = vld [vmem:[#allocation20_spill] sm:$0xff]  ;;  %v3362_v14 = vadd.f32 %v3106_v21, %v3099_v49  ;;  %vm1314_vm6 = vcmp.ge.f32.partialorder %v3134_v37, 0.0  ;;  %vm1315_vm7 = vcmp.ge.f32.partialorder %v3138_v38, 0.0 }
 0x1c5   :  { %4240 = vst [vmem:[#allocation19_spill] sm:$0xff] %v3334_v63  ;;  %4241 = vst [vmem:[#allocation24_spill] sm:$0xff] %v3338_v8  ;;  %v3346_v60 = vadd.f32 %v3106_v21, %v4244_v45  ;;  %vm1316_vm8 = vcmp.ge.f32.partialorder %v3142_v11, 0.0  ;;  %vm1317_vm9 = vcmp.ge.f32.partialorder %v3146_v54, 0.0  ;;  %v1372_v21 = vmul.f32 0.1, %v3110_v19 }
 0x1c6   :  { %4243 = vst [vmem:[#allocation26_spill] sm:$0xff] %v3342_v41  ;;  %4246 = vst [vmem:[#allocation3_spill] sm:$0xff] %v3350_v58  ;;  %v1373_v36 = vmul.f32 0.1, %v3114_v6  ;;  %v1374_v51 = vmul.f32 0.1, %v3118_v17 }
 0x1c7   :  { %4245 = vst [vmem:[#allocation22_spill] sm:$0xff] %v3346_v60  ;;  %4247 = vst [vmem:[#allocation5_spill] sm:$0xff] %v3354_v16  ;;  %vm1318_vm10 = vcmp.ge.f32.partialorder %v3150_v55, 0.0  ;;  %v1375_v34 = vmul.f32 0.1, %v3122_v28  ;;  %vm1319_vm11 = vcmp.ge.f32.partialorder %v3154_v29, 0.0  ;;  %v3388_v58 = vsel %vm1308_vm0, %v3110_v19, %v1372_v21 }
 0x1c8   :  { %4248 = vst [vmem:[#allocation7_spill] sm:$0xff] %v3358_v52  ;;  %4249 = vst [vmem:[#allocation4_spill] sm:$0xff] %v3362_v14  ;;  %v1376_v49 = vmul.f32 0.1, %v3126_v57  ;;  %v1377_v45 = vmul.f32 0.1, %v3130_v30  ;;  %v3399_v63 = vsel %vm1309_vm1, %v3114_v6, %v1373_v36 }
 0x1c9   :  { %v1378_v14 = vmul.f32 0.1, %v3134_v37  ;;  %v1379_v52 = vmul.f32 0.1, %v3138_v38  ;;  %v1380_v16 = vmul.f32 0.1, %v3142_v11  ;;  %v3429_v3 = vsel %vm1311_vm3, %v3122_v28, %v1375_v34 }
 0x1ca   :  { %4250 = vst [vmem:[#allocation6_spill] sm:$0xff] %v3388_v58  ;;  %vm1320_vm12 = vcmp.ge.f32.partialorder %v3158_v31, 0.0  ;;  %v1381_v60 = vmul.f32 0.1, %v3146_v54  ;;  %v1382_v41 = vmul.f32 0.1, %v3150_v55  ;;  %v3414_v58 = vsel %vm1310_vm2, %v3118_v17, %v1374_v51 }
 0x1cb   :  { %v3394_v8 = vmul.f32 0.1, %v3154_v29  ;;  %4251 = vst [vmem:[#allocation10_spill] sm:$0xff] %v3399_v63  ;;  %vm1321_vm13 = vcmp.ge.f32.partialorder %v3162_v42, 0.0  ;;  %v3403_v1 = vmul.f32 0.1, %v3158_v31 }
 0x1cc   :  { %v3406_v19 = vmul.f32 0.1, %v3162_v42  ;;  %v3409_v21 = vmul.f32 0.1, %v3166_v46  ;;  %4252 = vst [vmem:[#allocation13_spill] sm:$0xff] %v3414_v58  ;;  %vm1322_vm14 = vcmp.ge.f32.partialorder %v3166_v46, 0.0 }
 0x1cd   :  { %v3418_v6 = vmul.f32 0.1, %v3170_v40  ;;  %v3421_v36 = vmul.f32 0.1, %v3174_v44  ;;  %v3424_v63 = vmul.f32 0.1, %v3178_v59 }
 0x1ce   :  { %4254 = vst [vmem:[#allocation11_spill] sm:$0xff] %v3429_v3  ;;  %vm1323_vm15 = vcmp.ge.f32.partialorder %v3170_v40, 0.0  ;;  %v3433_v17 = vmul.f32 0.1, %v3182_v2  ;;  %v3436_v51 = vmul.f32 0.1, %v3186_v56 }
 0x1cf   :  { %4253 = vst [vmem:[#allocation8_spill] sm:$0xff] %v3424_v63  ;;  %v3439_v58 = vmul.f32 0.1, %v3190_v0  ;;  %v3444_v63 = vsel %vm1312_vm4, %v3126_v57, %v1376_v49  ;;  %vm1324_vm0 = vcmp.ge.f32.partialorder %v3174_v44, 0.0  ;;  %v3448_v28 = vmul.f32 0.1, %v3194_v15 }
 0x1d0   :  { %4256 = vst [vmem:[#allocation20_spill] sm:$0xff] %v3444_v63  ;;  %v3451_v34 = vmul.f32 0.1, %v3198_v22  ;;  %v3454_v3 = vmul.f32 0.1, %v3202_v12  ;;  %vm1325_vm1 = vcmp.ge.f32.partialorder %v3178_v59, 0.0 }
 0x1d1   :  { %4255 = vst [vmem:[#allocation16_spill] sm:$0xff] %v3439_v58  ;;  %v3459_v58 = vsel %vm1313_vm5, %v3130_v30, %v1377_v45  ;;  %v3463_v57 = vmul.f32 0.1, %v3206_v20  ;;  %v3466_v49 = vmul.f32 0.1, %v3210_v35  ;;  %vm1326_vm2 = vcmp.ge.f32.partialorder %v3182_v2, 0.0 }
 0x1d2   :  { %4257 = vst [vmem:[#allocation27_spill] sm:$0xff] %v3454_v3  ;;  %4258 = vst [vmem:[#allocation28_spill] sm:$0xff] %v3459_v58  ;;  %v3469_v63 = vmul.f32 0.1, %v3214_v50  ;;  %v3474_v3 = vsel %vm1314_vm6, %v3134_v37, %v1378_v14  ;;  %v3478_v30 = vmul.f32 0.1, %v3218_v32 }
 0x1d3   :  { %4260 = vst [vmem:[#allocation30_spill] sm:$0xff] %v3474_v3  ;;  %v3481_v45 = vmul.f32 0.1, %v3222_v4  ;;  %v3484_v58 = vmul.f32 0.1, %v3226_v10  ;;  %vm1327_vm3 = vcmp.ge.f32.partialorder %v3186_v56, 0.0 }
 0x1d4   :  { %4259 = vst [vmem:[#allocation29_spill] sm:$0xff] %v3469_v63  ;;  %v3489_v63 = vsel %vm1315_vm7, %v3138_v38, %v1379_v52  ;;  %v3495_v37 = vmul.f32 0.1, %v3230_v48  ;;  %v3498_v14 = vmul.f32 0.1, %v3234_v9  ;;  %v3506_v38 = vsel %vm1316_vm8, %v3142_v11, %v1380_v16 }
 0x1d5   :  { %4261 = vst [vmem:[#allocation31_spill] sm:$0xff] %v3489_v63  ;;  %v3501_v3 = vmul.f32 0.1, %v3238_v5  ;;  %4263 = vst [vmem:[#allocation33_spill] sm:$0xff] %v3506_v38  ;;  %vm1330_vm6 = vcmp.ge.f32.partialorder %v3198_v22, 0.0  ;;  %v3524_v11 = vsel %vm1317_vm9, %v3146_v54, %v1381_v60  ;;  %vm1334_vm8 = vcmp.ge.f32.partialorder %v3214_v50, 0.0 }
 0x1d6   :  { %v3513_v52 = vmul.f32 0.1, %v3242_v39  ;;  %v3516_v63 = vmul.f32 0.1, %v3246_v18  ;;  %4265 = vst [vmem:[#allocation35_spill] sm:$0xff] %v3524_v11  ;;  %v3542_v54 = vsel %vm1318_vm10, %v3150_v55, %v1382_v41  ;;  %vm1338_vm9 = vcmp.ge.f32.partialorder %v3230_v48, 0.0 }
 0x1d7   :  { %4262 = vst [vmem:[#allocation32_spill] sm:$0xff] %v3501_v3  ;;  %v3519_v3 = vmul.f32 0.1, %v3250_v25  ;;  %v3531_v16 = vmul.f32 0.1, %v3254_v26  ;;  %4267 = vst [vmem:[#allocation37_spill] sm:$0xff] %v3542_v54  ;;  %v3561_v55 = vsel %vm1319_vm11, %v3154_v29, %v3394_v8  ;;  %v3580_v29 = vsel %vm1320_vm12, %v3158_v31, %v3403_v1 }
 0x1d8   :  { %v3534_v38 = vmul.f32 0.1, %v3258_v13  ;;  %v3549_v60 = vmul.f32 0.1, %v3266_v33  ;;  %v3552_v11 = vmul.f32 0.1, %v3270_v27  ;;  %v3599_v31 = vsel %vm1321_vm13, %v3162_v42, %v3406_v19 }
 0x1d9   :  { %4264 = vst [vmem:[#allocation34_spill] sm:$0xff] %v3519_v3  ;;  %v3537_v3 = vmul.f32 0.1, %v3262_v53  ;;  %4269 = vst [vmem:[#allocation39_spill] sm:$0xff] %v3561_v55  ;;  %vm1342_vm10 = vcmp.ge.f32.partialorder %v3246_v18, 0.0  ;;  %vm1346_vm11 = vcmp.ge.f32.partialorder %v3262_v53, 0.0  ;;  %v3618_v42 = vsel %vm1322_vm14, %v3166_v46, %v3409_v21 }
 0x1da   :  { %v3568_v41 = vmul.f32 0.1, %v3278_v7  ;;  %v3571_v54 = vmul.f32 0.1, %v3282_v62  ;;  %4273 = vst [vmem:[#allocation43_spill] sm:$0xff] %v3580_v29  ;;  %4278 = vst [vmem:[#allocation46_spill] sm:$0xff] %v3599_v31  ;;  %v3637_v46 = vsel %vm1323_vm15, %v3170_v40, %v3418_v6  ;;  %v3650_v40 = vsel %vm1324_vm0, %v3174_v44, %v3421_v36 }
 0x1db   :  { %4266 = vst [vmem:[#allocation36_spill] sm:$0xff] %v3537_v3  ;;  %v3555_v3 = vmul.f32 0.1, %v3274_v61  ;;  %v3587_v8 = vmul.f32 0.1, %v3290_v43  ;;  %vm1350_vm12 = vcmp.ge.f32.partialorder %v3278_v7, 0.0 }
 0x1dc   :  { %4270 = vst [vmem:[#allocation40_spill] sm:$0xff] %v3568_v41  ;;  %4271 = vst [vmem:[#allocation41_spill] sm:$0xff] %v3571_v54  ;;  %v3590_v55 = vmul.f32 0.1, %v3294_v47  ;;  %v4279_v1 = vld [vmem:[#allocation18_spill] sm:$0xff]  ;;  %vm1354_vm13 = vcmp.ge.f32.partialorder %v3294_v47, 0.0 }
 0x1dd   :  { %4268 = vst [vmem:[#allocation38_spill] sm:$0xff] %v3555_v3  ;;  %v3574_v3 = vmul.f32 0.1, %v3286_v24  ;;  %4274 = vst [vmem:[#allocation44_spill] sm:$0xff] %v3587_v8  ;;  %v3606_v29 = vmul.f32 0.1, %v4279_v1 }
 0x1de   :  { %4275 = vst [vmem:[#allocation45_spill] sm:$0xff] %v3590_v55  ;;  %v4281_v55 = vld [vmem:[#allocation23_spill] sm:$0xff]  ;;  %4285 = vst [vmem:[#allocation50_spill] sm:$0xff] %v3618_v42  ;;  %v3625_v19 = vmul.f32 0.1, %v3314_v23  ;;  %v4287_v31 = vld [vmem:[#allocation12_spill] sm:$0xff] }
 0x1df   :  { %4272 = vst [vmem:[#allocation42_spill] sm:$0xff] %v3574_v3  ;;  %v4276_v3 = vld [vmem:[#allocation14_spill] sm:$0xff]  ;;  %4280 = vst [vmem:[#allocation47_spill] sm:$0xff] %v3606_v29  ;;  %v3609_v8 = vmul.f32 0.1, %v4281_v55  ;;  %v4292_v21 = vld [vmem:[#allocation21_spill] sm:$0xff] }
 0x1e0   :  { %v3593_v54 = vmul.f32 0.1, %v4276_v3  ;;  %4286 = vst [vmem:[#allocation51_spill] sm:$0xff] %v3625_v19  ;;  %4291 = vst [vmem:[#allocation54_spill] sm:$0xff] %v3637_v46  ;;  %v1426_v42 = vmul.f32 0.1, %v4292_v21 }
 0x1e1   :  { %4282 = vst [vmem:[#allocation48_spill] sm:$0xff] %v3609_v8  ;;  %v3628_v8 = vmul.f32 0.1, %v4287_v31  ;;  %v4294_v55 = vld [vmem:[#allocation19_spill] sm:$0xff]  ;;  %4295 = vst [vmem:[#allocation55_spill] sm:$0xff] %v3650_v40  ;;  %vm1362_vm15 = vcmp.ge.f32.partialorder %v4292_v21, 0.0 }
 0x1e2   :  { %4277 = vst [vmem:[#allocation14_spill] sm:$0xff] %v3593_v54  ;;  %v4283_v54 = vld [vmem:[#allocation25_spill] sm:$0xff]  ;;  %v4296_v6 = vld [vmem:[#allocation24_spill] sm:$0xff]  ;;  %v4298_v23 = vld [vmem:[#allocation22_spill] sm:$0xff]  ;;  %vm4306_vm7 = vcmp.ge.f32.partialorder %v3190_v0, 0.0 }
 0x1e3   :  { %v3612_v41 = vmul.f32 0.1, %v4283_v54  ;;  %4288 = vst [vmem:[#allocation52_spill] sm:$0xff] %v3628_v8  ;;  %vm1358_vm14 = vcmp.ge.f32.partialorder %v4283_v54, 0.0  ;;  %v4293_v8 = vld [vmem:[#allocation15_spill] sm:$0xff]  ;;  %v4299_v1 = vld [vmem:[#allocation8_spill] sm:$0xff] }
 0x1e4   :  { %v1427_v19 = vmul.f32 0.1, %v4293_v8  ;;  %v1429_v46 = vmul.f32 0.1, %v4296_v6  ;;  %v1431_v54 = vmul.f32 0.1, %v4298_v23  ;;  %v3663_v44 = vsel %vm1325_vm1, %v3178_v59, %v4299_v1 }
 0x1e5   :  { %4284 = vst [vmem:[#allocation49_spill] sm:$0xff] %v3612_v41  ;;  %v4289_v41 = vld [vmem:[#allocation17_spill] sm:$0xff]  ;;  %v4301_v36 = vld [vmem:[#allocation3_spill] sm:$0xff]  ;;  %v3676_v59 = vsel %vm1326_vm2, %v3182_v2, %v3433_v17  ;;  %v4304_v1 = vld [vmem:[#allocation4_spill] sm:$0xff]  ;;  %vm4307_vm2 = vcmp.ge.f32.partialorder %v3194_v15, 0.0  ;;  %v3703_v17 = vsel %vm1330_vm6, %v3198_v22, %v3451_v34  ;;  %vm4313_vm6 = vcmp.ge.f32.partialorder %v3218_v32, 0.0 }
 0x1e6   :  { %v3631_v29 = vmul.f32 0.1, %v4289_v41  ;;  %v4297_v41 = vld [vmem:[#allocation26_spill] sm:$0xff]  ;;  %vm1368_vm4 = vcmp.ge.f32.partialorder %v4301_v36, 0.0  ;;  %v4302_v40 = vld [vmem:[#allocation5_spill] sm:$0xff]  ;;  %v4303_v8 = vld [vmem:[#allocation7_spill] sm:$0xff]  ;;  %v3697_v2 = vsel %vm4307_vm2, %v3194_v15, %v3448_v28 }
 0x1e7   :  { %v1430_v31 = vmul.f32 0.1, %v4297_v41  ;;  %4300 = vst [vmem:[#allocation26_spill] sm:$0xff] %v3663_v44  ;;  %vm1366_vm0 = vcmp.ge.f32.partialorder %v4297_v41, 0.0  ;;  %v1432_v6 = vmul.f32 0.1, %v4301_v36  ;;  %v3685_v36 = vsel %vm1327_vm3, %v3186_v56, %v3436_v51 }
 0x1e8   :  { %4290 = vst [vmem:[#allocation53_spill] sm:$0xff] %v3631_v29  ;;  %v1428_v29 = vmul.f32 0.1, %v4294_v55  ;;  %v1433_v55 = vmul.f32 0.1, %v4302_v40  ;;  %vm1370_vm1 = vcmp.ge.f32.partialorder %v4303_v8, 0.0 }
 0x1e9   :  { %v1434_v21 = vmul.f32 0.1, %v4303_v8  ;;  %vm1371_vm5 = vcmp.ge.f32.partialorder %v4304_v1, 0.0  ;;  %v1435_v44 = vmul.f32 0.1, %v4304_v1  ;;  %v4305_v40 = vld [vmem:[#allocation16_spill] sm:$0xff] }
 0x1ea   :  { %v3691_v23 = vsel %vm4306_vm7, %v3190_v0, %v4305_v40  ;;  %v4308_v56 = vld [vmem:[#allocation27_spill] sm:$0xff]  ;;  %vm4309_vm3 = vcmp.ge.f32.partialorder %v3202_v12, 0.0  ;;  %vm4310_vm7 = vcmp.ge.f32.partialorder %v3206_v20, 0.0  ;;  %vm4311_vm2 = vcmp.ge.f32.partialorder %v3210_v35, 0.0  ;;  %v4312_v22 = vld [vmem:[#allocation29_spill] sm:$0xff] }
 0x1eb   :  { %v3709_v51 = vsel %vm4309_vm3, %v3202_v12, %v4308_v56  ;;  %v3715_v0 = vsel %vm4310_vm7, %v3206_v20, %v3463_v57  ;;  %v3721_v15 = vsel %vm4311_vm2, %v3210_v35, %v3466_v49  ;;  %v3727_v28 = vsel %vm1334_vm8, %v3214_v50, %v4312_v22  ;;  %v4346_v40 = vld [vmem:[#allocation25_spill] sm:$0xff] }
 0x1ec   :  { %v3733_v12 = vsel %vm4313_vm6, %v3218_v32, %v3478_v30  ;;  %vm4314_vm3 = vcmp.ge.f32.partialorder %v3222_v4, 0.0  ;;  %vm4315_vm7 = vcmp.ge.f32.partialorder %v3226_v10, 0.0  ;;  %v3751_v50 = vsel %vm1338_vm9, %v3230_v48, %v3495_v37  ;;  %v4348_v22 = vld [vmem:[#allocation9_spill] sm:$0xff] }
 0x1ed   :  { %v3739_v20 = vsel %vm4314_vm3, %v3222_v4, %v3481_v45  ;;  %v3745_v35 = vsel %vm4315_vm7, %v3226_v10, %v3484_v58  ;;  %vm4316_vm8 = vcmp.ge.f32.partialorder %v3234_v9, 0.0  ;;  %v4317_v4 = vld [vmem:[#allocation32_spill] sm:$0xff]  ;;  %vm4318_vm2 = vcmp.ge.f32.partialorder %v3238_v5, 0.0 }
 0x1ee   :  { %v3757_v32 = vsel %vm4316_vm8, %v3234_v9, %v3498_v14  ;;  %v3763_v34 = vsel %vm4318_vm2, %v3238_v5, %v4317_v4  ;;  %vm4319_vm6 = vcmp.ge.f32.partialorder %v3242_v39, 0.0  ;;  %v3775_v48 = vsel %vm1342_vm10, %v3246_v18, %v3516_v63  ;;  %v4320_v9 = vld [vmem:[#allocation34_spill] sm:$0xff]  ;;  %v4324_v18 = vld [vmem:[#allocation36_spill] sm:$0xff] }
 0x1ef   :  { %v3769_v10 = vsel %vm4319_vm6, %v3242_v39, %v3513_v52  ;;  %vm4321_vm9 = vcmp.ge.f32.partialorder %v3250_v25, 0.0  ;;  %vm4322_vm3 = vcmp.ge.f32.partialorder %v3254_v26, 0.0  ;;  %vm4323_vm7 = vcmp.ge.f32.partialorder %v3258_v13, 0.0  ;;  %v4340_v52 = vld [vmem:[#allocation18_spill] sm:$0xff] }
 0x1f0   :  { %v3781_v58 = vsel %vm4321_vm9, %v3250_v25, %v4320_v9  ;;  %v3787_v5 = vsel %vm4322_vm3, %v3254_v26, %v3531_v16  ;;  %v3793_v39 = vsel %vm4323_vm7, %v3258_v13, %v3534_v38  ;;  %v3799_v63 = vsel %vm1346_vm11, %v3262_v53, %v4324_v18  ;;  %v4327_v13 = vld [vmem:[#allocation38_spill] sm:$0xff]  ;;  %v4329_v53 = vld [vmem:[#allocation40_spill] sm:$0xff]  ;;  %v4343_v16 = vld [vmem:[#allocation23_spill] sm:$0xff] }
 0x1f1   :  { %vm4325_vm10 = vcmp.ge.f32.partialorder %v3266_v33, 0.0  ;;  %vm4326_vm8 = vcmp.ge.f32.partialorder %v3270_v27, 0.0  ;;  %vm4328_vm2 = vcmp.ge.f32.partialorder %v3274_v61, 0.0  ;;  %v3823_v49 = vsel %vm1350_vm12, %v3278_v7, %v4329_v53  ;;  %v4336_v7 = vld [vmem:[#allocation45_spill] sm:$0xff]  ;;  %v4350_v9 = vld [vmem:[#allocation52_spill] sm:$0xff] }
 0x1f2   :  { %v3805_v25 = vsel %vm4325_vm10, %v3266_v33, %v3549_v60  ;;  %v3811_v26 = vsel %vm4326_vm8, %v3270_v27, %v3552_v11  ;;  %v3817_v57 = vsel %vm4328_vm2, %v3274_v61, %v4327_v13  ;;  %v4330_v33 = vld [vmem:[#allocation41_spill] sm:$0xff]  ;;  %vm4331_vm11 = vcmp.ge.f32.partialorder %v3282_v62, 0.0  ;;  %v4332_v27 = vld [vmem:[#allocation42_spill] sm:$0xff]  ;;  %v4334_v61 = vld [vmem:[#allocation44_spill] sm:$0xff] }
 0x1f3   :  { %v3829_v30 = vsel %vm4331_vm11, %v3282_v62, %v4330_v33  ;;  %vm4333_vm6 = vcmp.ge.f32.partialorder %v3286_v24, 0.0  ;;  %vm4335_vm9 = vcmp.ge.f32.partialorder %v3290_v43, 0.0  ;;  %v3847_v14 = vsel %vm1354_vm13, %v3294_v47, %v4336_v7  ;;  %v4337_v62 = vld [vmem:[#allocation14_spill] sm:$0xff]  ;;  %v4345_v47 = vld [vmem:[#allocation49_spill] sm:$0xff]  ;;  %v4351_v18 = vld [vmem:[#allocation12_spill] sm:$0xff] }
 0x1f4   :  { %v3835_v45 = vsel %vm4333_vm6, %v3286_v24, %v4332_v27  ;;  %v3841_v37 = vsel %vm4335_vm9, %v3290_v43, %v4334_v61  ;;  %vm4338_vm12 = vcmp.ge.f32.partialorder %v4276_v3, 0.0  ;;  %v4339_v24 = vld [vmem:[#allocation47_spill] sm:$0xff]  ;;  %vm4341_vm3 = vcmp.ge.f32.partialorder %v4340_v52, 0.0  ;;  %v4342_v43 = vld [vmem:[#allocation48_spill] sm:$0xff]  ;;  %v4353_v53 = vld [vmem:[#allocation53_spill] sm:$0xff] }
 0x1f5   :  { %v3853_v38 = vsel %vm4338_vm12, %v4276_v3, %v4337_v62  ;;  %v3859_v11 = vsel %vm4341_vm3, %v4340_v52, %v4339_v24  ;;  %vm4344_vm7 = vcmp.ge.f32.partialorder %v4343_v16, 0.0  ;;  %v3871_v56 = vsel %vm1358_vm14, %v4346_v40, %v4345_v47  ;;  %v4347_v3 = vld [vmem:[#allocation51_spill] sm:$0xff]  ;;  %v4354_v33 = vld [vmem:[#allocation17_spill] sm:$0xff]  ;;  %v4363_v40 = vld [vmem:[#allocation22_spill] sm:$0xff] }
 0x1f6   :  { %v3865_v60 = vsel %vm4344_vm7, %v4343_v16, %v4342_v43  ;;  %vm4349_vm13 = vcmp.ge.f32.partialorder %v4348_v22, 0.0  ;;  %vm4352_vm10 = vcmp.ge.f32.partialorder %v4351_v18, 0.0  ;;  %vm4355_vm8 = vcmp.ge.f32.partialorder %v4354_v33, 0.0  ;;  %v4356_v61 = vld [vmem:[#allocation21_spill] sm:$0xff]  ;;  %v4357_v62 = vld [vmem:[#allocation15_spill] sm:$0xff]  ;;  %v4361_v16 = vld [vmem:[#allocation24_spill] sm:$0xff] }
 0x1f7   :  { %v3877_v4 = vsel %vm4349_vm13, %v4348_v22, %v4347_v3  ;;  %v3883_v13 = vsel %vm4352_vm10, %v4351_v18, %v4350_v9  ;;  %v3889_v27 = vsel %vm4355_vm8, %v4354_v33, %v4353_v53  ;;  %v3894_v7 = vsel %vm1362_vm15, %v4356_v61, %v1426_v42  ;;  %v4359_v52 = vld [vmem:[#allocation19_spill] sm:$0xff]  ;;  %v4366_v22 = vld [vmem:[#allocation5_spill] sm:$0xff]  ;;  %v4371_v9 = vld [vmem:[#allocation10_spill] sm:$0xff] }
 0x1f8   :  { %vm4358_vm14 = vcmp.ge.f32.partialorder %v4357_v62, 0.0  ;;  %vm4360_vm2 = vcmp.ge.f32.partialorder %v4359_v52, 0.0  ;;  %vm4362_vm11 = vcmp.ge.f32.partialorder %v4361_v16, 0.0  ;;  %v3914_v42 = vsel %vm1366_vm0, %v4297_v41, %v1430_v31  ;;  %v4365_v3 = vld [vmem:[#allocation3_spill] sm:$0xff]  ;;  %v4370_v31 = vld [vmem:[#allocation6_spill] sm:$0xff]  ;;  %v4374_v61 = vld [vmem:[#allocation20_spill] sm:$0xff] }
 0x1f9   :  { %v3899_v24 = vsel %vm4358_vm14, %v4357_v62, %v1427_v19  ;;  %v3904_v43 = vsel %vm4360_vm2, %v4359_v52, %v1428_v29  ;;  %v3909_v47 = vsel %vm4362_vm11, %v4361_v16, %v1429_v46  ;;  %vm4364_vm15 = vcmp.ge.f32.partialorder %v4363_v40, 0.0  ;;  %v4373_v53 = vld [vmem:[#allocation11_spill] sm:$0xff]  ;;  %v4375_v62 = vld [vmem:[#allocation28_spill] sm:$0xff]  ;;  %v4376_v52 = vld [vmem:[#allocation30_spill] sm:$0xff] }
 0x1fa   :  { %v3919_v19 = vsel %vm4364_vm15, %v4363_v40, %v1431_v54  ;;  %v3924_v29 = vsel %vm1368_vm4, %v4365_v3, %v1432_v6  ;;  %vm4367_vm6 = vcmp.ge.f32.partialorder %v4366_v22, 0.0  ;;  %v3934_v41 = vsel %vm1370_vm1, %v4303_v8, %v1434_v21  ;;  %v4372_v6 = vld [vmem:[#allocation13_spill] sm:$0xff]  ;;  %v4377_v16 = vld [vmem:[#allocation31_spill] sm:$0xff] }
 0x1fb   :  { %v3929_v46 = vsel %vm4367_vm6, %v4366_v22, %v1433_v55  ;;  %4369 = vst [vmem:[#allocation7_spill] sm:$0xff] %v3934_v41  ;;  %v3939_v54 = vsel %vm1371_vm5, %v4304_v1, %v1435_v44  ;;  %v1995_v18 = vpack.c.bf16 %v4371_v9, %v4370_v31  ;;  %v2000_v33 = vpack.c.bf16 %v4373_v53, %v4372_v6  ;;  %v4378_v3 = vld [vmem:[#allocation33_spill] sm:$0xff]  ;;  %v4379_v8 = vld [vmem:[#allocation35_spill] sm:$0xff]  ;;  %v4383_v1 = vld [vmem:[#allocation46_spill] sm:$0xff] }
 0x1fc   :  { %4368 = vst [vmem:[#allocation8_spill] sm:$0xff] %v3929_v46  ;;  %v2005_v55 = vpack.c.bf16 %v4375_v62, %v4374_v61  ;;  %v2010_v40 = vpack.c.bf16 %v4377_v16, %v4376_v52  ;;  %v2015_v21 = vpack.c.bf16 %v4379_v8, %v4378_v3  ;;  %v4380_v22 = vld [vmem:[#allocation37_spill] sm:$0xff]  ;;  %v4381_v41 = vld [vmem:[#allocation39_spill] sm:$0xff]  ;;  %v4384_v9 = vld [vmem:[#allocation50_spill] sm:$0xff] }
 0x1fd   :  { %v2020_v46 = vpack.c.bf16 %v4381_v41, %v4380_v22  ;;  %1996 = vst [vmem:[%s4105_s4] sm:$0xff] %v1995_v18   ;;  %2152 = vst [vmem:[%s4105_s4 + $0x8] sm:$0xff] %v2000_v33   ;;  %v4382_v44 = vld [vmem:[#allocation43_spill] sm:$0xff]  ;;  %v4385_v6 = vld [vmem:[#allocation54_spill] sm:$0xff]  ;;  %v2040_v41 = vpack.c.bf16 %v3685_v36, %v3676_v59  ;;  %v2045_v18 = vpack.c.bf16 %v3697_v2, %v3691_v23 }
 0x1fe   :  { %v2025_v31 = vpack.c.bf16 %v4383_v1, %v4382_v44  ;;  %v2030_v53 = vpack.c.bf16 %v4385_v6, %v4384_v9  ;;  %v4386_v61 = vld [vmem:[#allocation55_spill] sm:$0xff]  ;;  %v4387_v62 = vld [vmem:[#allocation26_spill] sm:$0xff]  ;;  %2153 = vst [vmem:[%s4105_s4 + $0x10] sm:$0xff] %v2005_v55   ;;  %2154 = vst [vmem:[%s4105_s4 + $0x18] sm:$0xff] %v2010_v40   ;;  %v2050_v36 = vpack.c.bf16 %v3709_v51, %v3703_v17 }
 0x1ff   :  { %v2035_v52 = vpack.c.bf16 %v4387_v62, %v4386_v61  ;;  %2155 = vst [vmem:[%s4105_s4 + $0x20] sm:$0xff] %v2015_v21   ;;  %2156 = vst [vmem:[%s4105_s4 + $0x28] sm:$0xff] %v2020_v46   ;;  %v2055_v59 = vpack.c.bf16 %v3721_v15, %v3715_v0  ;;  %v2060_v33 = vpack.c.bf16 %v3733_v12, %v3727_v28 }
 0x200   :  { %2157 = vst [vmem:[%s4105_s4 + $0x30] sm:$0xff] %v2025_v31   ;;  %2158 = vst [vmem:[%s4105_s4 + $0x38] sm:$0xff] %v2030_v53   ;;  %v2065_v23 = vpack.c.bf16 %v3745_v35, %v3739_v20  ;;  %v2070_v2 = vpack.c.bf16 %v3757_v32, %v3751_v50  ;;  %v2075_v17 = vpack.c.bf16 %v3769_v10, %v3763_v34 }
 0x201   :  { %2159 = vst [vmem:[%s4105_s4 + $0x40] sm:$0xff] %v2035_v52   ;;  %2160 = vst [vmem:[%s4105_s4 + $0x48] sm:$0xff] %v2040_v41   ;;  %v2080_v51 = vpack.c.bf16 %v3781_v58, %v3775_v48  ;;  %v2085_v0 = vpack.c.bf16 %v3793_v39, %v3787_v5  ;;  %v2090_v15 = vpack.c.bf16 %v3805_v25, %v3799_v63 }
 0x202   :  { %2161 = vst [vmem:[%s4105_s4 + $0x50] sm:$0xff] %v2045_v18   ;;  %2162 = vst [vmem:[%s4105_s4 + $0x58] sm:$0xff] %v2050_v36   ;;  %v2095_v28 = vpack.c.bf16 %v3817_v57, %v3811_v26  ;;  %v2100_v12 = vpack.c.bf16 %v3829_v30, %v3823_v49  ;;  %v2105_v20 = vpack.c.bf16 %v3841_v37, %v3835_v45  ;;  %v4389_v63 = vld [vmem:[#allocation7_spill] sm:$0xff] }
 0x203   :  { %2163 = vst [vmem:[%s4105_s4 + $0x60] sm:$0xff] %v2055_v59   ;;  %2164 = vst [vmem:[%s4105_s4 + $0x68] sm:$0xff] %v2060_v33   ;;  %v2110_v35 = vpack.c.bf16 %v3853_v38, %v3847_v14  ;;  %v2115_v50 = vpack.c.bf16 %v3865_v60, %v3859_v11  ;;  %v2120_v32 = vpack.c.bf16 %v3877_v4, %v3871_v56  ;;  %v4388_v5 = vld [vmem:[#allocation8_spill] sm:$0xff] }
 0x204   :  { %2165 = vst [vmem:[%s4105_s4 + $0x70] sm:$0xff] %v2065_v23   ;;  %2166 = vst [vmem:[%s4105_s4 + $0x78] sm:$0xff] %v2070_v2   ;;  %v2125_v34 = vpack.c.bf16 %v3889_v27, %v3883_v13  ;;  %v2130_v10 = vpack.c.bf16 %v3899_v24, %v3894_v7  ;;  %v2135_v48 = vpack.c.bf16 %v3909_v47, %v3904_v43 }
 0x205   :  { %2167 = vst [vmem:[%s4105_s4 + $0x80] sm:$0xff] %v2075_v17   ;;  %2168 = vst [vmem:[%s4105_s4 + $0x88] sm:$0xff] %v2080_v51   ;;  %v2140_v58 = vpack.c.bf16 %v3919_v19, %v3914_v42  ;;  %v2145_v39 = vpack.c.bf16 %v4388_v5, %v3924_v29  ;;  %v2150_v25 = vpack.c.bf16 %v3939_v54, %v4389_v63 }
 0x206   :  { %2169 = vst [vmem:[%s4105_s4 + $0x90] sm:$0xff] %v2085_v0   ;;  %2170 = vst [vmem:[%s4105_s4 + $0x98] sm:$0xff] %v2090_v15  }
 0x207   :  { %2171 = vst [vmem:[%s4105_s4 + $0xa0] sm:$0xff] %v2095_v28   ;;  %2172 = vst [vmem:[%s4105_s4 + $0xa8] sm:$0xff] %v2100_v12  }
 0x208   :  { %2173 = vst [vmem:[%s4105_s4 + $0xb0] sm:$0xff] %v2105_v20   ;;  %2174 = vst [vmem:[%s4105_s4 + $0xb8] sm:$0xff] %v2110_v35  }
 0x209   :  { %2175 = vst [vmem:[%s4105_s4 + $0xc0] sm:$0xff] %v2115_v50   ;;  %2176 = vst [vmem:[%s4105_s4 + $0xc8] sm:$0xff] %v2120_v32  }
 0x20a   :  { %2177 = vst [vmem:[%s4105_s4 + $0xd0] sm:$0xff] %v2125_v34   ;;  %2178 = vst [vmem:[%s4105_s4 + $0xd8] sm:$0xff] %v2130_v10  }
 0x20b   :  { %2179 = vst [vmem:[%s4105_s4 + $0xe0] sm:$0xff] %v2135_v48   ;;  %2180 = vst [vmem:[%s4105_s4 + $0xe8] sm:$0xff] %v2140_v58  }
 0x20c   :  { %2181 = vst [vmem:[%s4105_s4 + $0xf0] sm:$0xff] %v2145_v39   ;;  %2182 = vst [vmem:[%s4105_s4 + $0xf8] sm:$0xff] %v2150_v25  }

</bundles_post_ra>
